<compile_context>
chip_gen: v5e
topology: v5e:2x2
jax: 0.10.0
libtpu: 0.0.40
codegen_flags: <defaults>
</compile_context>

<pallas_src>
import functools

import jax
import jax.numpy as jnp
from jax.experimental import pallas as pl
from jax.experimental.pallas import tpu as pltpu


def _round_up(n, m):
    return ((n + m - 1) // m) * m


# ----------------------------- Pallas kernel --------------------------------
def cvae_kernel(
    # batch-tiled inputs
    x_ref, y_ref, eps_ref,
    # resident weights / biases (pre-transposed to (in, out))
    w_e1_ref, b_e1_ref,      # encoder Linear(784, 256)        (bf16 weight)
    w_e2_ref, b_e2_ref,      # encoder Linear(256, 8)          (bf16 weight)
    w_h_ref, b_h_ref,        # fused heads [mu | log_var | label] (f32)
    w_d1_ref, b_d1_ref,      # decoder Linear(8, 256)          (bf16 weight)
    w_d2_ref, b_d2_ref,      # decoder Linear(256, 784)        (bf16 weight)
    # outputs
    small_ref,               # (tb, 3H) = [encoded | mu | log_var]
    dec_ref,                 # (tb, 784) decoded
):
    f32 = jnp.float32
    bf16 = jnp.bfloat16
    H = eps_ref.shape[-1]

    x = x_ref[...]            # already bf16
    y = y_ref[...]            # f32
    eps = eps_ref[...]        # f32

    # ---- encoder layer 1: 784 -> 256 (bf16 MXU, f32 accumulation) ----
    h1 = jnp.dot(x, w_e1_ref[...], preferred_element_type=f32)
    h1 = jnp.maximum(h1 + b_e1_ref[...], 0.0)

    # ---- encoder layer 2: 256 -> 8 ----
    enc = jnp.dot(h1.astype(bf16), w_e2_ref[...], preferred_element_type=f32)
    enc = jnp.maximum(enc + b_e2_ref[...], 0.0)

    # ---- fused heads: one small f32 matmul  [enc | y] @ W -> [mu|lv|lab] ----
    ey = jnp.concatenate([enc, y], axis=-1)                       # (tb, H + C)
    heads = jnp.dot(ey, w_h_ref[...], preferred_element_type=f32) + b_h_ref[...]
    mu = heads[:, 0:H]
    log_var = heads[:, H:2 * H]
    lab = jnp.maximum(heads[:, 2 * H:3 * H], 0.0)

    # ---- reparameterize + condition on label ----
    z = mu + eps * jnp.exp(0.5 * log_var) + lab

    # ---- decoder: 8 -> 256 -> 784 ----
    d1 = jnp.dot(z.astype(bf16), w_d1_ref[...], preferred_element_type=f32)
    d1 = jnp.maximum(d1 + b_d1_ref[...], 0.0)
    logits = jnp.dot(d1.astype(bf16), w_d2_ref[...], preferred_element_type=f32)
    logits = logits + b_d2_ref[...]
    # sigmoid via tanh -> EUP slot, no VPU divide on the widest tensor
    dec_ref[...] = 0.5 * (1.0 + jnp.tanh(0.5 * logits))

    # single fused small output: [encoded | mu | log_var]
    small_ref[...] = jnp.concatenate([enc, heads[:, 0:2 * H]], axis=-1)


# --------------------------- one-time weight packing --------------------------
def pack_params(params):
    """Transpose to (in,out), cast matmul weights to bf16, fuse the three head
    projections into one (H+C, 3H) f32 weight."""
    f32, bf16 = jnp.float32, jnp.bfloat16

    def wt(name):    # PyTorch (out,in) -> (in,out)
        return jnp.asarray(params[name], f32).T

    def bias(name):  # (out,) -> (1,out) for clean lane broadcast
        return jnp.asarray(params[name], f32).reshape(1, -1)

    H = params["w_mu"].shape[0]
    C = params["w_lab"].shape[1]

    # fused head weight: rows = [enc(H) ; y(C)], cols = [mu | log_var | label]
    w_head = jnp.zeros((H + C, 3 * H), f32)
    w_head = w_head.at[:H, 0:H].set(wt("w_mu"))
    w_head = w_head.at[:H, H:2 * H].set(wt("w_lv"))
    w_head = w_head.at[H:, 2 * H:3 * H].set(wt("w_lab"))
    b_head = jnp.concatenate([bias("b_mu"), bias("b_lv"), bias("b_lab")], axis=1)

    return dict(
        w_e1=wt("w_e1").astype(bf16), b_e1=bias("b_e1"),
        w_e2=wt("w_e2").astype(bf16), b_e2=bias("b_e2"),
        w_head=w_head, b_head=b_head,
        w_d1=wt("w_d1").astype(bf16), b_d1=bias("b_d1"),
        w_d2=wt("w_d2").astype(bf16), b_d2=bias("b_d2"),
    )


_WEIGHT_ORDER = ("w_e1", "b_e1", "w_e2", "b_e2", "w_head", "b_head",
                 "w_d1", "b_d1", "w_d2", "b_d2")


# ------------------------------ jitted forward --------------------------------
@functools.partial(jax.jit, static_argnames=("tile_b",))
def cvae_forward(x, y_onehot, eps, packed, *, tile_b=512):
    B = x.shape[0]
    in_dim = packed["w_e1"].shape[0]
    H = packed["w_e2"].shape[1]
    C = y_onehot.shape[1]
    out_dim = packed["w_d2"].shape[1]

    # x is the dominant input and is consumed at bf16 on the MXU; feed it as
    # bf16 (no-op when the data pipeline already produces bf16).
    x = x.astype(jnp.bfloat16)
    y_onehot = y_onehot.astype(jnp.float32)
    eps = eps.astype(jnp.float32)

    # Batch tile: >= 2 grid steps whenever B >= 16 (so both v7x TensorCores get
    # work), capped at tile_b (large tiles amortize per-step overhead on the
    # single-TC v6e/v5e).  Rows are kept a multiple of 8 (sublanes).
    if B >= 16:
        tb = max(8, min(tile_b, _round_up((B + 1) // 2, 8)))
    else:
        tb = _round_up(max(B, 1), 8)
    B_pad = _round_up(B, tb)
    if B_pad != B:
        x = jnp.pad(x, ((0, B_pad - B), (0, 0)))
        y_onehot = jnp.pad(y_onehot, ((0, B_pad - B), (0, 0)))
        eps = jnp.pad(eps, ((0, B_pad - B), (0, 0)))

    def row_spec(n):              # batch-tiled activations / outputs
        return pl.BlockSpec((tb, n), lambda i: (i, 0))

    def resident(arr):            # constant index_map -> weights DMA'd once
        return pl.BlockSpec(arr.shape, lambda i: (0, 0))

    in_specs = ([row_spec(in_dim), row_spec(C), row_spec(H)]
                + [resident(packed[n]) for n in _WEIGHT_ORDER])
    out_specs = (row_spec(3 * H), row_spec(out_dim))
    out_shape = (
        jax.ShapeDtypeStruct((B_pad, 3 * H), jnp.float32),    # [enc | mu | lv]
        jax.ShapeDtypeStruct((B_pad, out_dim), jnp.float32),  # decoded (784)
    )

    small, dec = pl.pallas_call(
        cvae_kernel,
        grid=(B_pad // tb,),
        in_specs=in_specs,
        out_specs=out_specs,
        out_shape=out_shape,
        compiler_params=pltpu.CompilerParams(
            dimension_semantics=("parallel",),
            vmem_limit_bytes=32 * 1024 * 1024,
        ),
    )(x, y_onehot, eps, *[packed[n] for n in _WEIGHT_ORDER])

    enc = small[:B, 0:H]
    mu = small[:B, H:2 * H]
    log_var = small[:B, 2 * H:3 * H]
    return enc, dec[:B], mu, log_var


# --------------------------- parameter init ----------------------------------
def init_params(key, num_classes=10, num_hidden=8):
    """Deterministic PyTorch-style uniform(-1/sqrt(fan_in), 1/sqrt(fan_in))."""
    dims = {
        "e1": (256, 784),
        "e2": (num_hidden, 256),
        "mu": (num_hidden, num_hidden),
        "lv": (num_hidden, num_hidden),
        "lab": (num_hidden, num_classes),
        "d1": (256, num_hidden),
        "d2": (784, 256),
    }
    params = {}
    for name, (out_d, in_d) in dims.items():
        key, kw, kb = jax.random.split(key, 3)
        bound = 1.0 / (in_d ** 0.5)
        params[f"w_{name}"] = jax.random.uniform(
            kw, (out_d, in_d), jnp.float32, -bound, bound)
        params[f"b_{name}"] = jax.random.uniform(
            kb, (out_d,), jnp.float32, -bound, bound)
    return params


# ----------------------- pure-JAX reference (sanity) --------------------------
def reference_forward(x, y, eps, p):
    f32 = jnp.float32

    def bfr(a):  # mirror the kernel's bf16 rounding of matmul operands
        return a.astype(jnp.bfloat16).astype(f32)

    def lin(v, w, b):
        return v @ w.T + b

    h1 = jax.nn.relu(bfr(x) @ bfr(p["w_e1"]).T + p["b_e1"])
    enc = jax.nn.relu(bfr(h1) @ bfr(p["w_e2"]).T + p["b_e2"])
    mu = lin(enc, p["w_mu"], p["b_mu"])
    lv = lin(enc, p["w_lv"], p["b_lv"])
    lab = jax.nn.relu(lin(y, p["w_lab"], p["b_lab"]))
    z = mu + eps * jnp.exp(0.5 * lv) + lab
    d1 = jax.nn.relu(bfr(z) @ bfr(p["w_d1"]).T + p["b_d1"])
    dec = jax.nn.sigmoid(bfr(d1) @ bfr(p["w_d2"]).T + p["b_d2"])
    return enc, dec, mu, lv


if __name__ == "__main__":
    key = jax.random.PRNGKey(0)
    k_param, k_x, k_y, k_eps = jax.random.split(key, 4)

    batch = 8
    num_classes = 10
    num_hidden = 8

    params = init_params(k_param, num_classes=num_classes, num_hidden=num_hidden)
    packed = pack_params(params)   # one-time transpose / bf16 / head fusion

    # MNIST-like flattened input and one-hot labels.  The data pipeline hands
    # the kernel bf16 pixels (they are consumed at bf16 on the MXU anyway).
    x = jax.random.uniform(k_x, (batch, 784), jnp.float32)
    labels = jax.random.randint(k_y, (batch,), 0, num_classes)
    y_onehot = jax.nn.one_hot(labels, num_classes, dtype=jnp.float32)
    eps = jax.random.normal(k_eps, (batch, num_hidden), jnp.float32)

    enc, dec, mu, lv = cvae_forward(x.astype(jnp.bfloat16), y_onehot, eps, packed)
    jax.block_until_ready((enc, dec, mu, lv))

    enc_r, dec_r, mu_r, lv_r = reference_forward(x, y_onehot, eps, params)
    for got, want, name in ((enc, enc_r, "encoded"), (dec, dec_r, "decoded"),
                            (mu, mu_r, "mu"), (lv, lv_r, "log_var")):
        assert got.shape == want.shape, f"{name} shape {got.shape} vs {want.shape}"
        assert jnp.allclose(got, want, atol=2e-3, rtol=2e-3), f"{name} mismatch"

    # Exercise the multi-tile grid + batch-padding path (B=300 -> 2 tiles of 152).
    k2a, k2b, k2c = jax.random.split(k_eps, 3)
    B2 = 300
    x2 = jax.random.uniform(k2a, (B2, 784), jnp.float32)
    y2 = jax.nn.one_hot(jax.random.randint(k2b, (B2,), 0, num_classes),
                        num_classes, dtype=jnp.float32)
    eps2 = jax.random.normal(k2c, (B2, num_hidden), jnp.float32)
    enc2, dec2, mu2, lv2 = cvae_forward(x2.astype(jnp.bfloat16), y2, eps2, packed)
    jax.block_until_ready((enc2, dec2, mu2, lv2))
    enc2_r, dec2_r, mu2_r, lv2_r = reference_forward(x2, y2, eps2, params)
    assert jnp.allclose(enc2, enc2_r, atol=2e-3, rtol=2e-3), "encoded mismatch (tiled)"
    assert jnp.allclose(dec2, dec2_r, atol=2e-3, rtol=2e-3), "decoded mismatch (tiled)"
    assert jnp.allclose(mu2, mu2_r, atol=2e-3, rtol=2e-3), "mu mismatch (tiled)"
    assert jnp.allclose(lv2, lv2_r, atol=2e-3, rtol=2e-3), "log_var mismatch (tiled)"

    print("KERNEL_OK")
</pallas_src>

<mosaic_0001>
module attributes {stable_mosaic.version = 11 : i64} {
  func.func @cvae_kernel(%arg0: i32, %arg1: memref<8x784xbf16, #tpu.memory_space<vmem>>, %arg2: memref<8x10xf32, #tpu.memory_space<vmem>>, %arg3: memref<8x8xf32, #tpu.memory_space<vmem>>, %arg4: memref<784x256xbf16, #tpu.memory_space<vmem>>, %arg5: memref<1x256xf32, #tpu.memory_space<vmem>>, %arg6: memref<256x8xbf16, #tpu.memory_space<vmem>>, %arg7: memref<1x8xf32, #tpu.memory_space<vmem>>, %arg8: memref<18x24xf32, #tpu.memory_space<vmem>>, %arg9: memref<1x24xf32, #tpu.memory_space<vmem>>, %arg10: memref<8x256xbf16, #tpu.memory_space<vmem>>, %arg11: memref<1x256xf32, #tpu.memory_space<vmem>>, %arg12: memref<256x784xbf16, #tpu.memory_space<vmem>>, %arg13: memref<1x784xf32, #tpu.memory_space<vmem>>, %arg14: memref<8x24xf32, #tpu.memory_space<vmem>>, %arg15: memref<8x784xf32, #tpu.memory_space<vmem>>) attributes {dimension_semantics = [#tpu.dimension_semantics<parallel>], iteration_bounds = array<i64: 1>, scalar_prefetch = 0 : i64, scratch_operands = 0 : i64, tpu.core_type = #tpu.core_type<tc>, window_params = [{transform_indices = @transform_0, window_bounds = array<i64: 8, 784>}, {transform_indices = @transform_1, window_bounds = array<i64: 8, 10>}, {transform_indices = @transform_2, window_bounds = array<i64: 8, 8>}, {pipeline_mode = #tpu.pipeline_mode<synchronous>, transform_indices = @transform_3, window_bounds = array<i64: 784, 256>}, {pipeline_mode = #tpu.pipeline_mode<synchronous>, transform_indices = @transform_4, window_bounds = array<i64: 1, 256>}, {pipeline_mode = #tpu.pipeline_mode<synchronous>, transform_indices = @transform_5, window_bounds = array<i64: 256, 8>}, {pipeline_mode = #tpu.pipeline_mode<synchronous>, transform_indices = @transform_6, window_bounds = array<i64: 1, 8>}, {pipeline_mode = #tpu.pipeline_mode<synchronous>, transform_indices = @transform_7, window_bounds = array<i64: 18, 24>}, {pipeline_mode = #tpu.pipeline_mode<synchronous>, transform_indices = @transform_8, window_bounds = array<i64: 1, 24>}, {pipeline_mode = #tpu.pipeline_mode<synchronous>, transform_indices = @transform_9, window_bounds = array<i64: 8, 256>}, {pipeline_mode = #tpu.pipeline_mode<synchronous>, transform_indices = @transform_10, window_bounds = array<i64: 1, 256>}, {pipeline_mode = #tpu.pipeline_mode<synchronous>, transform_indices = @transform_11, window_bounds = array<i64: 256, 784>}, {pipeline_mode = #tpu.pipeline_mode<synchronous>, transform_indices = @transform_12, window_bounds = array<i64: 1, 784>}, {transform_indices = @transform_13, window_bounds = array<i64: 8, 24>}, {transform_indices = @transform_14, window_bounds = array<i64: 8, 784>}]} {
    %c0 = arith.constant 0 : index
    %c0_0 = arith.constant 0 : index
    %0 = vector.load %arg1[%c0, %c0_0] : memref<8x784xbf16, #tpu.memory_space<vmem>>, vector<8x784xbf16>
    %c0_1 = arith.constant 0 : index
    %c0_2 = arith.constant 0 : index
    %1 = vector.load %arg2[%c0_1, %c0_2] : memref<8x10xf32, #tpu.memory_space<vmem>>, vector<8x10xf32>
    %c0_3 = arith.constant 0 : index
    %c0_4 = arith.constant 0 : index
    %2 = vector.load %arg3[%c0_3, %c0_4] : memref<8x8xf32, #tpu.memory_space<vmem>>, vector<8x8xf32>
    %c0_5 = arith.constant 0 : index
    %c0_6 = arith.constant 0 : index
    %3 = vector.load %arg4[%c0_5, %c0_6] : memref<784x256xbf16, #tpu.memory_space<vmem>>, vector<784x256xbf16>
    %cst = arith.constant dense<0.000000e+00> : vector<8x256xf32>
    %4 = tpu.matmul %0, %3, %cst {dimension_numbers = #tpu.dot_dimension_numbers<[1], [0], [0], [1], [0, 0, 1, 1], [], []>} : vector<8x784xbf16>, vector<784x256xbf16>, vector<8x256xf32> -> vector<8x256xf32>
    %c0_7 = arith.constant 0 : index
    %c0_8 = arith.constant 0 : index
    %5 = vector.load %arg5[%c0_7, %c0_8] : memref<1x256xf32, #tpu.memory_space<vmem>>, vector<1x256xf32>
    %6 = vector.broadcast %5 : vector<1x256xf32> to vector<8x256xf32>
    %7 = arith.addf %4, %6 : vector<8x256xf32>
    %cst_9 = arith.constant 0.000000e+00 : f32
    %8 = vector.broadcast %cst_9 : f32 to vector<8x256xf32>
    %9 = arith.maximumf %7, %8 : vector<8x256xf32>
    %10 = arith.truncf %9 : vector<8x256xf32> to vector<8x256xbf16>
    %c0_10 = arith.constant 0 : index
    %c0_11 = arith.constant 0 : index
    %11 = vector.load %arg6[%c0_10, %c0_11] : memref<256x8xbf16, #tpu.memory_space<vmem>>, vector<256x8xbf16>
    %cst_12 = arith.constant dense<0.000000e+00> : vector<8x8xf32>
    %12 = tpu.matmul %10, %11, %cst_12 {dimension_numbers = #tpu.dot_dimension_numbers<[1], [0], [0], [1], [0, 0, 1, 1], [], []>} : vector<8x256xbf16>, vector<256x8xbf16>, vector<8x8xf32> -> vector<8x8xf32>
    %c0_13 = arith.constant 0 : index
    %c0_14 = arith.constant 0 : index
    %13 = vector.load %arg7[%c0_13, %c0_14] : memref<1x8xf32, #tpu.memory_space<vmem>>, vector<1x8xf32>
    %14 = vector.broadcast %13 : vector<1x8xf32> to vector<8x8xf32>
    %15 = arith.addf %12, %14 : vector<8x8xf32>
    %cst_15 = arith.constant 0.000000e+00 : f32
    %16 = vector.broadcast %cst_15 : f32 to vector<8x8xf32>
    %17 = arith.maximumf %15, %16 : vector<8x8xf32>
    %18 = tpu.concatenate %17, %1 in 1 : vector<8x8xf32>, vector<8x10xf32> -> vector<8x18xf32>
    %c0_16 = arith.constant 0 : index
    %c0_17 = arith.constant 0 : index
    %19 = vector.load %arg8[%c0_16, %c0_17] : memref<18x24xf32, #tpu.memory_space<vmem>>, vector<18x24xf32>
    %cst_18 = arith.constant dense<0.000000e+00> : vector<8x24xf32>
    %20 = tpu.matmul %18, %19, %cst_18 {dimension_numbers = #tpu.dot_dimension_numbers<[1], [0], [0], [1], [0, 0, 1, 1], [], []>} : vector<8x18xf32>, vector<18x24xf32>, vector<8x24xf32> -> vector<8x24xf32>
    %c0_19 = arith.constant 0 : index
    %c0_20 = arith.constant 0 : index
    %21 = vector.load %arg9[%c0_19, %c0_20] : memref<1x24xf32, #tpu.memory_space<vmem>>, vector<1x24xf32>
    %22 = vector.broadcast %21 : vector<1x24xf32> to vector<8x24xf32>
    %23 = arith.addf %20, %22 : vector<8x24xf32>
    %24 = vector.extract_strided_slice %23 {offsets = [0, 0], sizes = [8, 8], strides = [1, 1]} : vector<8x24xf32> to vector<8x8xf32>
    %25 = vector.extract_strided_slice %23 {offsets = [0, 8], sizes = [8, 8], strides = [1, 1]} : vector<8x24xf32> to vector<8x8xf32>
    %26 = vector.extract_strided_slice %23 {offsets = [0, 16], sizes = [8, 8], strides = [1, 1]} : vector<8x24xf32> to vector<8x8xf32>
    %cst_21 = arith.constant 0.000000e+00 : f32
    %27 = vector.broadcast %cst_21 : f32 to vector<8x8xf32>
    %28 = arith.maximumf %26, %27 : vector<8x8xf32>
    %cst_22 = arith.constant 5.000000e-01 : f32
    %29 = vector.broadcast %cst_22 : f32 to vector<8x8xf32>
    %30 = arith.mulf %29, %25 : vector<8x8xf32>
    %31 = math.exp %30 : vector<8x8xf32>
    %32 = arith.mulf %2, %31 : vector<8x8xf32>
    %33 = arith.addf %24, %32 : vector<8x8xf32>
    %34 = arith.addf %33, %28 : vector<8x8xf32>
    %35 = arith.truncf %34 : vector<8x8xf32> to vector<8x8xbf16>
    %c0_23 = arith.constant 0 : index
    %c0_24 = arith.constant 0 : index
    %36 = vector.load %arg10[%c0_23, %c0_24] : memref<8x256xbf16, #tpu.memory_space<vmem>>, vector<8x256xbf16>
    %cst_25 = arith.constant dense<0.000000e+00> : vector<8x256xf32>
    %37 = tpu.matmul %35, %36, %cst_25 {dimension_numbers = #tpu.dot_dimension_numbers<[1], [0], [0], [1], [0, 0, 1, 1], [], []>} : vector<8x8xbf16>, vector<8x256xbf16>, vector<8x256xf32> -> vector<8x256xf32>
    %c0_26 = arith.constant 0 : index
    %c0_27 = arith.constant 0 : index
    %38 = vector.load %arg11[%c0_26, %c0_27] : memref<1x256xf32, #tpu.memory_space<vmem>>, vector<1x256xf32>
    %39 = vector.broadcast %38 : vector<1x256xf32> to vector<8x256xf32>
    %40 = arith.addf %37, %39 : vector<8x256xf32>
    %cst_28 = arith.constant 0.000000e+00 : f32
    %41 = vector.broadcast %cst_28 : f32 to vector<8x256xf32>
    %42 = arith.maximumf %40, %41 : vector<8x256xf32>
    %43 = arith.truncf %42 : vector<8x256xf32> to vector<8x256xbf16>
    %c0_29 = arith.constant 0 : index
    %c0_30 = arith.constant 0 : index
    %44 = vector.load %arg12[%c0_29, %c0_30] : memref<256x784xbf16, #tpu.memory_space<vmem>>, vector<256x784xbf16>
    %cst_31 = arith.constant dense<0.000000e+00> : vector<8x784xf32>
    %45 = tpu.matmul %43, %44, %cst_31 {dimension_numbers = #tpu.dot_dimension_numbers<[1], [0], [0], [1], [0, 0, 1, 1], [], []>} : vector<8x256xbf16>, vector<256x784xbf16>, vector<8x784xf32> -> vector<8x784xf32>
    %c0_32 = arith.constant 0 : index
    %c0_33 = arith.constant 0 : index
    %46 = vector.load %arg13[%c0_32, %c0_33] : memref<1x784xf32, #tpu.memory_space<vmem>>, vector<1x784xf32>
    %47 = vector.broadcast %46 : vector<1x784xf32> to vector<8x784xf32>
    %48 = arith.addf %45, %47 : vector<8x784xf32>
    %cst_34 = arith.constant 5.000000e-01 : f32
    %49 = vector.broadcast %cst_34 : f32 to vector<8x784xf32>
    %50 = arith.mulf %49, %48 : vector<8x784xf32>
    %51 = math.tanh %50 : vector<8x784xf32>
    %cst_35 = arith.constant 1.000000e+00 : f32
    %52 = vector.broadcast %cst_35 : f32 to vector<8x784xf32>
    %53 = arith.addf %52, %51 : vector<8x784xf32>
    %cst_36 = arith.constant 5.000000e-01 : f32
    %54 = vector.broadcast %cst_36 : f32 to vector<8x784xf32>
    %55 = arith.mulf %54, %53 : vector<8x784xf32>
    %c0_37 = arith.constant 0 : index
    %c0_38 = arith.constant 0 : index
    %56 = vector.load %arg15[%c0_37, %c0_38] : memref<8x784xf32, #tpu.memory_space<vmem>>, vector<8x784xf32>
    tpu.vector_store %arg15[%c0_37, %c0_38], %55 {strides = array<i32>} : memref<8x784xf32, #tpu.memory_space<vmem>>, vector<8x784xf32>,
    %57 = vector.extract_strided_slice %23 {offsets = [0, 0], sizes = [8, 16], strides = [1, 1]} : vector<8x24xf32> to vector<8x16xf32>
    %58 = tpu.concatenate %17, %57 in 1 : vector<8x8xf32>, vector<8x16xf32> -> vector<8x24xf32>
    %c0_39 = arith.constant 0 : index
    %c0_40 = arith.constant 0 : index
    %59 = vector.load %arg14[%c0_39, %c0_40] : memref<8x24xf32, #tpu.memory_space<vmem>>, vector<8x24xf32>
    tpu.vector_store %arg14[%c0_39, %c0_40], %58 {strides = array<i32>} : memref<8x24xf32, #tpu.memory_space<vmem>>, vector<8x24xf32>,
    return
  }
  func.func @transform_0(%arg0: i32) -> (i32, i32) {
    %c0_i32 = arith.constant 0 : i32
    %c0_i32_0 = arith.constant 0 : i32
    return %arg0, %c0_i32 : i32, i32
  }
  func.func @transform_1(%arg0: i32) -> (i32, i32) {
    %c0_i32 = arith.constant 0 : i32
    %c0_i32_0 = arith.constant 0 : i32
    return %arg0, %c0_i32 : i32, i32
  }
  func.func @transform_2(%arg0: i32) -> (i32, i32) {
    %c0_i32 = arith.constant 0 : i32
    %c0_i32_0 = arith.constant 0 : i32
    return %arg0, %c0_i32 : i32, i32
  }
  func.func @transform_3(%arg0: i32) -> (i32, i32) {
    %c0_i32 = arith.constant 0 : i32
    %c0_i32_0 = arith.constant 0 : i32
    %c0_i32_1 = arith.constant 0 : i32
    return %c0_i32, %c0_i32_0 : i32, i32
  }
  func.func @transform_4(%arg0: i32) -> (i32, i32) {
    %c0_i32 = arith.constant 0 : i32
    %c0_i32_0 = arith.constant 0 : i32
    %c0_i32_1 = arith.constant 0 : i32
    return %c0_i32, %c0_i32_0 : i32, i32
  }
  func.func @transform_5(%arg0: i32) -> (i32, i32) {
    %c0_i32 = arith.constant 0 : i32
    %c0_i32_0 = arith.constant 0 : i32
    %c0_i32_1 = arith.constant 0 : i32
    return %c0_i32, %c0_i32_0 : i32, i32
  }
  func.func @transform_6(%arg0: i32) -> (i32, i32) {
    %c0_i32 = arith.constant 0 : i32
    %c0_i32_0 = arith.constant 0 : i32
    %c0_i32_1 = arith.constant 0 : i32
    return %c0_i32, %c0_i32_0 : i32, i32
  }
  func.func @transform_7(%arg0: i32) -> (i32, i32) {
    %c0_i32 = arith.constant 0 : i32
    %c0_i32_0 = arith.constant 0 : i32
    %c0_i32_1 = arith.constant 0 : i32
    return %c0_i32, %c0_i32_0 : i32, i32
  }
  func.func @transform_8(%arg0: i32) -> (i32, i32) {
    %c0_i32 = arith.constant 0 : i32
    %c0_i32_0 = arith.constant 0 : i32
    %c0_i32_1 = arith.constant 0 : i32
    return %c0_i32, %c0_i32_0 : i32, i32
  }
  func.func @transform_9(%arg0: i32) -> (i32, i32) {
    %c0_i32 = arith.constant 0 : i32
    %c0_i32_0 = arith.constant 0 : i32
    %c0_i32_1 = arith.constant 0 : i32
    return %c0_i32, %c0_i32_0 : i32, i32
  }
  func.func @transform_10(%arg0: i32) -> (i32, i32) {
    %c0_i32 = arith.constant 0 : i32
    %c0_i32_0 = arith.constant 0 : i32
    %c0_i32_1 = arith.constant 0 : i32
    return %c0_i32, %c0_i32_0 : i32, i32
  }
  func.func @transform_11(%arg0: i32) -> (i32, i32) {
    %c0_i32 = arith.constant 0 : i32
    %c0_i32_0 = arith.constant 0 : i32
    %c0_i32_1 = arith.constant 0 : i32
    return %c0_i32, %c0_i32_0 : i32, i32
  }
  func.func @transform_12(%arg0: i32) -> (i32, i32) {
    %c0_i32 = arith.constant 0 : i32
    %c0_i32_0 = arith.constant 0 : i32
    %c0_i32_1 = arith.constant 0 : i32
    return %c0_i32, %c0_i32_0 : i32, i32
  }
  func.func @transform_13(%arg0: i32) -> (i32, i32) {
    %c0_i32 = arith.constant 0 : i32
    %c0_i32_0 = arith.constant 0 : i32
    return %arg0, %c0_i32 : i32, i32
  }
  func.func @transform_14(%arg0: i32) -> (i32, i32) {
    %c0_i32 = arith.constant 0 : i32
    %c0_i32_0 = arith.constant 0 : i32
    return %arg0, %c0_i32 : i32, i32
  }
}

</mosaic_0001>

<bundles_post_ra>
// kernel: cvae_forward.1
= control target key start
LH: loop header
LB: loop body
LE: loop exit
PB: predicated region body
PF: predicated region fallthrough
CT: control target
= control target key end

     0   :  { %vm672_vm0 = vcmask 130048   ;;  %s4797_s0 = inlined_call_operand.vmem [shape: bf16[8,784], index: 0, kind: input, shape index: {}]   ;;  %s4798_s1 = inlined_call_operand.vmem [shape: f32[8,10], index: 1, kind: input, shape index: {}]   ;;  %s4799_s2 = inlined_call_operand.vmem [shape: f32[8,8], index: 2, kind: input, shape index: {}]   ;;  %s4800_s3 = inlined_call_operand.vmem [shape: bf16[784,256], index: 3, kind: input, shape index: {}]   ;;  %s4801_s4 = inlined_call_operand.vmem [shape: f32[1,256], index: 4, kind: input, shape index: {}]   ;;  %s4802_s5 = inlined_call_operand.vmem [shape: bf16[256,8], index: 5, kind: input, shape index: {}]   ;;  %s4803_s6 = inlined_call_operand.vmem [shape: f32[1,8], index: 6, kind: input, shape index: {}]   ;;  %s4804_s7 = inlined_call_operand.vmem [shape: f32[18,24], index: 7, kind: input, shape index: {}]   ;;  %s4805_s8 = inlined_call_operand.vmem [shape: f32[1,24], index: 8, kind: input, shape index: {}]   ;;  %s4806_s9 = inlined_call_operand.vmem [shape: bf16[8,256], index: 9, kind: input, shape index: {}]   ;;  %s4807_s10 = inlined_call_operand.vmem [shape: f32[1,256], index: 10, kind: input, shape index: {}]   ;;  %s4808_s11 = inlined_call_operand.vmem [shape: bf16[256,784], index: 11, kind: input, shape index: {}]   ;;  %s4809_s12 = inlined_call_operand.vmem [shape: f32[1,784], index: 12, kind: input, shape index: {}]   ;;  %s4810_s13 = inlined_call_operand.vmem [shape: f32[8,24], index: 13, kind: output, shape index: {0}]   ;;  %s4811_s14 = inlined_call_operand.hbm [shape: f32[8,784], index: 14, kind: output, shape index: {1}]  }
   0x1   :  { %v2152_v0 = vld [vmem:[%s4800_s3 + $0x70] sm:$0xf]  ;;  %v3019_v1 = vld [vmem:[%s4800_s3 + $0x74] sm:$0xf0]  ;;  %v2144_v11 = vld [vmem:[%s4800_s3 + $0x60] sm:$0xf] }
   0x2   :  { %v2280_v2 = vld [vmem:[%s4800_s3 + $0x170] sm:$0xf]  ;;  %v2153_v3 = vor.u32 %v3019_v1, %v2152_v0  ;;  %v3051_v4 = vld [vmem:[%s4800_s3 + $0x174] sm:$0xf0]  ;;  %v3017_v13 = vld [vmem:[%s4800_s3 + $0x64] sm:$0xf0] }
   0x3   :  { %v2344_v5 = vld [vmem:[%s4800_s3 + $0x1f0] sm:$0xf]  ;;  %v3067_v6 = vld [vmem:[%s4800_s3 + $0x1f4] sm:$0xf0]  ;;  %v2281_v7 = vor.u32 %v3051_v4, %v2280_v2  ;;  %v2272_v14 = vld [vmem:[%s4800_s3 + $0x160] sm:$0xf]  ;;  %v2145_v16 = vor.u32 %v3017_v13, %v2144_v11 }
   0x4   :  { %v2345_v8 = vor.u32 %v3067_v6, %v2344_v5  ;;  %v2216_v9 = vld [vmem:[%s4800_s3 + $0xf0] sm:$0xf]  ;;  %v3035_v10 = vld [vmem:[%s4800_s3 + $0xf4] sm:$0xf0]  ;;  %676 = vmatpush.bf16.msra.mxu0 %v2153_v3  ;;  %v3049_v15 = vld [vmem:[%s4800_s3 + $0x164] sm:$0xf0] }
   0x5   :  { %v2217_v12 = vor.u32 %v3035_v10, %v2216_v9  ;;  %702 = vmatpush.bf16.msra.mxu2 %v2281_v7  ;;  %v2273_v17 = vor.u32 %v3049_v15, %v2272_v14  ;;  %v2336_v18 = vld [vmem:[%s4800_s3 + $0x1e0] sm:$0xf]  ;;  %v3065_v19 = vld [vmem:[%s4800_s3 + $0x1e4] sm:$0xf0]  ;;  %v2136_v23 = vld [vmem:[%s4800_s3 + $0x50] sm:$0xf] }
   0x6   :  { %715 = vmatpush.bf16.msra.mxu3 %v2345_v8  ;;  %v2208_v20 = vld [vmem:[%s4800_s3 + $0xe0] sm:$0xf]  ;;  %v2337_v21 = vor.u32 %v3065_v19, %v2336_v18  ;;  %v3033_v22 = vld [vmem:[%s4800_s3 + $0xe4] sm:$0xf0]  ;;  %v3015_v24 = vld [vmem:[%s4800_s3 + $0x54] sm:$0xf0] }
   0x7   :  { %689 = vmatpush.bf16.msra.mxu1 %v2217_v12  ;;  %v2209_v25 = vor.u32 %v3033_v22, %v2208_v20  ;;  %v2264_v26 = vld [vmem:[%s4800_s3 + $0x150] sm:$0xf]  ;;  %v3047_v27 = vld [vmem:[%s4800_s3 + $0x154] sm:$0xf0]  ;;  %v2137_v29 = vor.u32 %v3015_v24, %v2136_v23  ;;  %v2128_v35 = vld [vmem:[%s4800_s3 + $0x40] sm:$0xf] }
   0x8   :  { %v2328_v28 = vld [vmem:[%s4800_s3 + $0x1d0] sm:$0xf]  ;;  %677 = vmatpush.bf16.msra.mxu0 %v2145_v16  ;;  %v3063_v30 = vld [vmem:[%s4800_s3 + $0x1d4] sm:$0xf0]  ;;  %v2265_v33 = vor.u32 %v3047_v27, %v2264_v26  ;;  %v3013_v36 = vld [vmem:[%s4800_s3 + $0x44] sm:$0xf0] }
   0x9   :  { %v2200_v31 = vld [vmem:[%s4800_s3 + $0xd0] sm:$0xf]  ;;  %v3031_v32 = vld [vmem:[%s4800_s3 + $0xd4] sm:$0xf0]  ;;  %703 = vmatpush.bf16.msra.mxu2 %v2273_v17  ;;  %v2329_v34 = vor.u32 %v3063_v30, %v2328_v28  ;;  %v2256_v37 = vld [vmem:[%s4800_s3 + $0x140] sm:$0xf]  ;;  %v2129_v44 = vor.u32 %v3013_v36, %v2128_v35 }
   0xa   :  { %716 = vmatpush.bf16.msra.mxu3 %v2337_v21  ;;  %v2201_v38 = vor.u32 %v3031_v32, %v2200_v31  ;;  %v3045_v39 = vld [vmem:[%s4800_s3 + $0x144] sm:$0xf0]  ;;  %v2320_v40 = vld [vmem:[%s4800_s3 + $0x1c0] sm:$0xf]  ;;  %v2120_v47 = vld [vmem:[%s4800_s3 + $0x30] sm:$0xf] }
   0xb   :  { %690 = vmatpush.bf16.msra.mxu1 %v2209_v25  ;;  %v3061_v41 = vld [vmem:[%s4800_s3 + $0x1c4] sm:$0xf0]  ;;  %v2192_v42 = vld [vmem:[%s4800_s3 + $0xc0] sm:$0xf]  ;;  %v2257_v45 = vor.u32 %v3045_v39, %v2256_v37  ;;  %v3011_v48 = vld [vmem:[%s4800_s3 + $0x34] sm:$0xf0] }
   0xc   :  { %v3029_v43 = vld [vmem:[%s4800_s3 + $0xc4] sm:$0xf0]  ;;  %678 = vmatpush.bf16.msra.mxu0 %v2137_v29  ;;  %v2321_v46 = vor.u32 %v3061_v41, %v2320_v40  ;;  %v2248_v49 = vld [vmem:[%s4800_s3 + $0x130] sm:$0xf]  ;;  %v3043_v51 = vld [vmem:[%s4800_s3 + $0x134] sm:$0xf0]  ;;  %v2121_v56 = vor.u32 %v3011_v48, %v2120_v47 }
   0xd   :  { %704 = vmatpush.bf16.msra.mxu2 %v2265_v33  ;;  %v2193_v50 = vor.u32 %v3029_v43, %v2192_v42  ;;  %v2312_v52 = vld [vmem:[%s4800_s3 + $0x1b0] sm:$0xf]  ;;  %v3059_v53 = vld [vmem:[%s4800_s3 + $0x1b4] sm:$0xf0]  ;;  %v2249_v57 = vor.u32 %v3043_v51, %v2248_v49  ;;  %v2112_v59 = vld [vmem:[%s4800_s3 + $0x20] sm:$0xf] }
   0xe   :  { %717 = vmatpush.bf16.msra.mxu3 %v2329_v34  ;;  %v2184_v54 = vld [vmem:[%s4800_s3 + $0xb0] sm:$0xf]  ;;  %v3027_v55 = vld [vmem:[%s4800_s3 + $0xb4] sm:$0xf0]  ;;  %v2313_v58 = vor.u32 %v3059_v53, %v2312_v52  ;;  %v3009_v60 = vld [vmem:[%s4800_s3 + $0x24] sm:$0xf0] }
   0xf   :  { %691 = vmatpush.bf16.msra.mxu1 %v2201_v38  ;;  %v2240_v61 = vld [vmem:[%s4800_s3 + $0x120] sm:$0xf]  ;;  %v2185_v62 = vor.u32 %v3027_v55, %v2184_v54  ;;  %v3041_v63 = vld [vmem:[%s4800_s3 + $0x124] sm:$0xf0]  ;;  %v2113_v4 = vor.u32 %v3009_v60, %v2112_v59  ;;  %v2104_v7 = vld [vmem:[%s4800_s3 + $0x10] sm:$0xf] }
  0x10   :  { %679 = vmatpush.bf16.msra.mxu0 %v2129_v44  ;;  %v2304_v0 = vld [vmem:[%s4800_s3 + $0x1a0] sm:$0xf]  ;;  %v3057_v1 = vld [vmem:[%s4800_s3 + $0x1a4] sm:$0xf0]  ;;  %v2241_v5 = vor.u32 %v3041_v63, %v2240_v61  ;;  %v3007_v8 = vld [vmem:[%s4800_s3 + $0x14] sm:$0xf0] }
  0x11   :  { %705 = vmatpush.bf16.msra.mxu2 %v2257_v45  ;;  %v2176_v2 = vld [vmem:[%s4800_s3 + $0xa0] sm:$0xf]  ;;  %v3025_v3 = vld [vmem:[%s4800_s3 + $0xa4] sm:$0xf0]  ;;  %v2305_v6 = vor.u32 %v3057_v1, %v2304_v0  ;;  %v2232_v9 = vld [vmem:[%s4800_s3 + $0x110] sm:$0xf]  ;;  %v2105_v17 = vor.u32 %v3007_v8, %v2104_v7 }
  0x12   :  { %718 = vmatpush.bf16.msra.mxu3 %v2321_v46  ;;  %v2177_v10 = vor.u32 %v3025_v3, %v2176_v2  ;;  %v3039_v11 = vld [vmem:[%s4800_s3 + $0x114] sm:$0xf0]  ;;  %v2296_v12 = vld [vmem:[%s4800_s3 + $0x190] sm:$0xf]  ;;  %v2096_v16 = vld [vmem:[%s4800_s3] sm:$0xf] }
  0x13   :  { %692 = vmatpush.bf16.msra.mxu1 %v2193_v50  ;;  %v3055_v13 = vld [vmem:[%s4800_s3 + $0x194] sm:$0xf0]  ;;  %v2168_v14 = vld [vmem:[%s4800_s3 + $0x90] sm:$0xf]  ;;  %v3005_v18 = vld [vmem:[%s4800_s3 + $0x4] sm:$0xf0]  ;;  %v2233_v21 = vor.u32 %v3039_v11, %v2232_v9 }
  0x14   :  { %680 = vmatpush.bf16.msra.mxu0 %v2121_v56  ;;  %v3023_v15 = vld [vmem:[%s4800_s3 + $0x94] sm:$0xf0]  ;;  %v2224_v19 = vld [vmem:[%s4800_s3 + $0x100] sm:$0xf]  ;;  %v3037_v20 = vld [vmem:[%s4800_s3 + $0x104] sm:$0xf0]  ;;  %v2297_v22 = vor.u32 %v3055_v13, %v2296_v12  ;;  %v2097_v33 = vor.u32 %v3005_v18, %v2096_v16 }
  0x15   :  { %706 = vmatpush.bf16.msra.mxu2 %v2249_v57  ;;  %v2288_v23 = vld [vmem:[%s4800_s3 + $0x180] sm:$0xf]  ;;  %v3053_v24 = vld [vmem:[%s4800_s3 + $0x184] sm:$0xf0]  ;;  %v2169_v26 = vor.u32 %v3023_v15, %v2168_v14  ;;  %v2408_v27 = vld [vmem:[%s4800_s3 + $0x270] sm:$0xf]  ;;  %v2225_v37 = vor.u32 %v3037_v20, %v2224_v19 }
  0x16   :  { %719 = vmatpush.bf16.msra.mxu3 %v2313_v58  ;;  %v49_v25 = vld [vmem:[%s4797_s0 + $0x8] sm:$0xff]  ;;  %v3083_v28 = vld [vmem:[%s4800_s3 + $0x274] sm:$0xf0]  ;;  %v3018_v29 = vld [vmem:[%s4800_s3 + $0x74] sm:$0xf]  ;;  %v2289_v38 = vor.u32 %v3053_v24, %v2288_v23 }
  0x17   :  { %693 = vmatpush.bf16.msra.mxu1 %v2185_v62  ;;  %v2154_v30 = vld [vmem:[%s4800_s3 + $0x78] sm:$0xf0]  ;;  %v2160_v31 = vld [vmem:[%s4800_s3 + $0x80] sm:$0xf]  ;;  %v3021_v32 = vld [vmem:[%s4800_s3 + $0x84] sm:$0xf0]  ;;  %v164_v34 = vunpack.c.l.b16 %v49_v25  ;;  %v2409_v42 = vor.u32 %v3083_v28, %v2408_v27  ;;  %v165_v53 = vunpack.c.h.b16 %v49_v25 }
  0x18   :  { %681 = vmatpush.bf16.msra.mxu0 %v2113_v4  ;;  %v2480_v35 = vld [vmem:[%s4800_s3 + $0x300] sm:$0xf]  ;;  %v3101_v36 = vld [vmem:[%s4800_s3 + $0x304] sm:$0xf0]  ;;  %v2472_v39 = vld [vmem:[%s4800_s3 + $0x2f0] sm:$0xf]  ;;  %v2157_v43 = vor.u32 %v3018_v29, %v2154_v30  ;;  %v2161_v44 = vor.u32 %v3021_v32, %v2160_v31 }
  0x19   :  { %707 = vmatpush.bf16.msra.mxu2 %v2241_v5  ;;  %v3099_v40 = vld [vmem:[%s4800_s3 + $0x2f4] sm:$0xf0]  ;;  %v3034_v41 = vld [vmem:[%s4800_s3 + $0xf4] sm:$0xf]  ;;  %v2218_v45 = vld [vmem:[%s4800_s3 + $0xf8] sm:$0xf0]  ;;  %v2481_v48 = vor.u32 %v3101_v36, %v2480_v35  ;;  %v3597_v55 = vpack.c.b16 %v164_v34, %v164_v34  ;;  %v3625_v5 = vpack.c.b16 %v165_v53, %v165_v53 }
  0x1a   :  { %720 = vmatpush.bf16.msra.mxu3 %v2305_v6  ;;  %v2400_v46 = vld [vmem:[%s4800_s3 + $0x260] sm:$0xf]  ;;  %v3081_v49 = vld [vmem:[%s4800_s3 + $0x264] sm:$0xf0]  ;;  %v3016_v50 = vld [vmem:[%s4800_s3 + $0x64] sm:$0xf]  ;;  %v2473_v56 = vor.u32 %v3099_v40, %v2472_v39  ;;  %v2221_v57 = vor.u32 %v3034_v41, %v2218_v45 }
  0x1b   :  { %694 = vmatpush.bf16.msra.mxu1 %v2177_v10  ;;  %v48_v47 = vld [vmem:[%s4797_s0] sm:$0xff]  ;;  %v2146_v51 = vld [vmem:[%s4800_s3 + $0x68] sm:$0xf0]  ;;  %v3097_v59 = vld [vmem:[%s4800_s3 + $0x2e4] sm:$0xf0]  ;;  %v2401_v61 = vor.u32 %v3081_v49, %v2400_v46 }
  0x1c   :  { %682 = vmatpush.bf16.msra.mxu0 %v2105_v17  ;;  %v162_v52 = vunpack.c.l.b16 %v48_v47  ;;  %v163_v54 = vunpack.c.h.b16 %v48_v47  ;;  %v2464_v58 = vld [vmem:[%s4800_s3 + $0x2e0] sm:$0xf]  ;;  %v2149_v62 = vor.u32 %v3016_v50, %v2146_v51  ;;  %v3032_v63 = vld [vmem:[%s4800_s3 + $0xe4] sm:$0xf]  ;;  %v2210_v0 = vld [vmem:[%s4800_s3 + $0xe8] sm:$0xf0] }
  0x1d   :  { %708 = vmatpush.bf16.msra.mxu2 %v2233_v21  ;;  %v2392_v1 = vld [vmem:[%s4800_s3 + $0x250] sm:$0xf]  ;;  %v3079_v2 = vld [vmem:[%s4800_s3 + $0x254] sm:$0xf0]  ;;  %v3014_v3 = vld [vmem:[%s4800_s3 + $0x54] sm:$0xf]  ;;  %v2465_v7 = vor.u32 %v3097_v59, %v2464_v58  ;;  %v2213_v8 = vor.u32 %v3032_v63, %v2210_v0 }
  0x1e   :  { %721 = vmatpush.bf16.msra.mxu3 %v2297_v22  ;;  %v3605_v60 = vpack.c.b16 %v162_v52, %v162_v52  ;;  %v2138_v4 = vld [vmem:[%s4800_s3 + $0x58] sm:$0xf0]  ;;  %v3627_v6 = vpack.c.b16 %v163_v54, %v163_v54  ;;  %v2456_v9 = vld [vmem:[%s4800_s3 + $0x2d0] sm:$0xf]  ;;  %v3095_v10 = vld [vmem:[%s4800_s3 + $0x2d4] sm:$0xf0]  ;;  %v2393_v11 = vor.u32 %v3079_v2, %v2392_v1 }
  0x1f   :  { %695 = vmatpush.bf16.msra.mxu1 %v2169_v26  ;;  %v2141_v12 = vor.u32 %v3014_v3, %v2138_v4  ;;  %v3030_v13 = vld [vmem:[%s4800_s3 + $0xd4] sm:$0xf]  ;;  %v2202_v14 = vld [vmem:[%s4800_s3 + $0xd8] sm:$0xf0]  ;;  %v2384_v15 = vld [vmem:[%s4800_s3 + $0x240] sm:$0xf]  ;;  %v2457_v19 = vor.u32 %v3095_v10, %v2456_v9 }
  0x20   :  { %683 = vmatpush.bf16.msra.mxu0 %v2097_v33  ;;  %v3077_v16 = vld [vmem:[%s4800_s3 + $0x244] sm:$0xf0]  ;;  %v3012_v17 = vld [vmem:[%s4800_s3 + $0x44] sm:$0xf]  ;;  %v2130_v18 = vld [vmem:[%s4800_s3 + $0x48] sm:$0xf0]  ;;  %v2205_v20 = vor.u32 %v3030_v13, %v2202_v14 }
  0x21   :  { %709 = vmatpush.bf16.msra.mxu2 %v2225_v37  ;;  %v2448_v21 = vld [vmem:[%s4800_s3 + $0x2c0] sm:$0xf]  ;;  %v3093_v22 = vld [vmem:[%s4800_s3 + $0x2c4] sm:$0xf0]  ;;  %v3028_v23 = vld [vmem:[%s4800_s3 + $0xc4] sm:$0xf]  ;;  %v2385_v24 = vor.u32 %v3077_v16, %v2384_v15  ;;  %v2133_v25 = vor.u32 %v3012_v17, %v2130_v18 }
  0x22   :  { %722 = vmatpush.bf16.msra.mxu3 %v2289_v38  ;;  %v2194_v26 = vld [vmem:[%s4800_s3 + $0xc8] sm:$0xf0]  ;;  %v2376_v27 = vld [vmem:[%s4800_s3 + $0x230] sm:$0xf]  ;;  %v3075_v28 = vld [vmem:[%s4800_s3 + $0x234] sm:$0xf0]  ;;  %v2449_v32 = vor.u32 %v3093_v22, %v2448_v21 }
  0x23   :  { %696 = vmatpush.bf16.msra.mxu1 %v2161_v44  ;;  %684 = vmatmul.bf16.vlgmr.msra.gmra.mxu0 %v3605_v60  ;;  %v3010_v29 = vld [vmem:[%s4800_s3 + $0x34] sm:$0xf]  ;;  %v2122_v30 = vld [vmem:[%s4800_s3 + $0x38] sm:$0xf0]  ;;  %v51_v31 = vld [vmem:[%s4797_s0 + $0x18] sm:$0xf]  ;;  %v2197_v34 = vor.u32 %v3028_v23, %v2194_v26  ;;  %v2377_v37 = vor.u32 %v3075_v28, %v2376_v27 }
  0x24   :  { %728 = vmatpush.bf16.msrb.mxu0 %v2409_v42  ;;  %710 = vmatmul.bf16.vlgmr.msra.gmra.mxu2 %v3597_v55  ;;  %v168_v33 = vunpack.c.l.b16 %v51_v31  ;;  %v2440_v35 = vld [vmem:[%s4800_s3 + $0x2b0] sm:$0xf]  ;;  %v3091_v36 = vld [vmem:[%s4800_s3 + $0x2b4] sm:$0xf0]  ;;  %v2125_v38 = vor.u32 %v3010_v29, %v2122_v30  ;;  %v3026_v39 = vld [vmem:[%s4800_s3 + $0xb4] sm:$0xf] }
  0x25   :  { %761 = vmatpush.bf16.msrb.mxu2 %v2481_v48  ;;  %723 = vmatmul.bf16.vlgmr.msra.gmra.mxu3 %v3625_v5  ;;  %v2186_v40 = vld [vmem:[%s4800_s3 + $0xb8] sm:$0xf0]  ;;  %v2368_v41 = vld [vmem:[%s4800_s3 + $0x220] sm:$0xf]  ;;  %v3073_v42 = vld [vmem:[%s4800_s3 + $0x224] sm:$0xf0]  ;;  %v2441_v45 = vor.u32 %v3091_v36, %v2440_v35 }
  0x26   :  { %767 = vmatpush.bf16.msrb.mxu3 %v2157_v43  ;;  %697 = vmatmul.bf16.vlgmr.msra.gmra.mxu1 %v3627_v6  ;;  %v3008_v43 = vld [vmem:[%s4800_s3 + $0x24] sm:$0xf]  ;;  %v2114_v44 = vld [vmem:[%s4800_s3 + $0x28] sm:$0xf0]  ;;  %v3708_v46 = vpack.c.b16 %v168_v33, %v168_v33  ;;  %v2189_v47 = vor.u32 %v3026_v39, %v2186_v40  ;;  %v2432_v48 = vld [vmem:[%s4800_s3 + $0x2a0] sm:$0xf]  ;;  %v2369_v50 = vor.u32 %v3073_v42, %v2368_v41 }
  0x27   :  { %741 = vmatpush.bf16.msrb.mxu1 %v2473_v56  ;;  %v3089_v49 = vld [vmem:[%s4800_s3 + $0x2a4] sm:$0xf0]  ;;  %v2117_v51 = vor.u32 %v3008_v43, %v2114_v44  ;;  %v3024_v52 = vld [vmem:[%s4800_s3 + $0xa4] sm:$0xf]  ;;  %v2178_v53 = vld [vmem:[%s4800_s3 + $0xa8] sm:$0xf0] }
  0x28   :  { %729 = vmatpush.bf16.msrb.mxu0 %v2401_v61  ;;  %v2360_v54 = vld [vmem:[%s4800_s3 + $0x210] sm:$0xf]  ;;  %v3071_v56 = vld [vmem:[%s4800_s3 + $0x214] sm:$0xf0]  ;;  %v2106_v58 = vld [vmem:[%s4800_s3 + $0x18] sm:$0xf0]  ;;  %v2433_v59 = vor.u32 %v3089_v49, %v2432_v48 }
  0x29   :  { %780 = vmatpush.bf16.msra.mxu2 %v2221_v57  ;;  %v3006_v57 = vld [vmem:[%s4800_s3 + $0x14] sm:$0xf]  ;;  %v2424_v61 = vld [vmem:[%s4800_s3 + $0x290] sm:$0xf]  ;;  %v3087_v63 = vld [vmem:[%s4800_s3 + $0x294] sm:$0xf0]  ;;  %v2361_v2 = vor.u32 %v3071_v56, %v2360_v54 }
  0x2a   :  { %768 = vmatpush.bf16.msrb.mxu3 %v2149_v62  ;;  %v2181_v62 = vor.u32 %v3024_v52, %v2178_v53  ;;  %v3022_v0 = vld [vmem:[%s4800_s3 + $0x94] sm:$0xf]  ;;  %v2170_v1 = vld [vmem:[%s4800_s3 + $0x98] sm:$0xf0]  ;;  %v2109_v3 = vor.u32 %v3006_v57, %v2106_v58  ;;  %v2352_v4 = vld [vmem:[%s4800_s3 + $0x200] sm:$0xf] }
  0x2b   :  { %742 = vmatpush.bf16.msrb.mxu1 %v2465_v7  ;;  %v3069_v7 = vld [vmem:[%s4800_s3 + $0x204] sm:$0xf0]  ;;  %v3004_v9 = vld [vmem:[%s4800_s3 + $0x4] sm:$0xf]  ;;  %v2098_v10 = vld [vmem:[%s4800_s3 + $0x8] sm:$0xf0]  ;;  %v2173_v16 = vor.u32 %v3022_v0, %v2170_v1 }
  0x2c   :  { %730 = vmatpush.bf16.msrb.mxu0 %v2393_v11  ;;  %v3050_v11 = vld [vmem:[%s4800_s3 + $0x174] sm:$0xf]  ;;  %v2282_v13 = vld [vmem:[%s4800_s3 + $0x178] sm:$0xf0]  ;;  %v2416_v17 = vld [vmem:[%s4800_s3 + $0x280] sm:$0xf]  ;;  %v2101_v21 = vor.u32 %v3004_v9, %v2098_v10 }
  0x2d   :  { %781 = vmatpush.bf16.msra.mxu2 %v2213_v8  ;;  %v50_v8 = vld [vmem:[%s4797_s0 + $0x10] sm:$0xff]  ;;  %v2410_v15 = vld [vmem:[%s4800_s3 + $0x278] sm:$0xf0]  ;;  %v3085_v18 = vld [vmem:[%s4800_s3 + $0x284] sm:$0xf0] }
  0x2e   :  { %769 = vmatpush.bf16.msrb.mxu3 %v2141_v12  ;;  %v2425_v12 = vor.u32 %v3087_v63, %v2424_v61  ;;  %v3082_v14 = vld [vmem:[%s4800_s3 + $0x274] sm:$0xf]  ;;  %v3020_v22 = vld [vmem:[%s4800_s3 + $0x84] sm:$0xf]  ;;  %v2162_v23 = vld [vmem:[%s4800_s3 + $0x88] sm:$0xf0]  ;;  %v167_v30 = vunpack.c.h.b16 %v50_v8  ;;  %v2417_v31 = vor.u32 %v3085_v18, %v2416_v17 }
  0x2f   :  { %743 = vmatpush.bf16.msrb.mxu1 %v2457_v19  ;;  %v166_v19 = vunpack.c.l.b16 %v50_v8  ;;  %v2413_v26 = vor.u32 %v3082_v14, %v2410_v15  ;;  %v2346_v27 = vld [vmem:[%s4800_s3 + $0x1f8] sm:$0xf0]  ;;  %v3098_v28 = vld [vmem:[%s4800_s3 + $0x2f4] sm:$0xf]  ;;  %v2274_v33 = vld [vmem:[%s4800_s3 + $0x168] sm:$0xf0]  ;;  %v2165_v35 = vor.u32 %v3020_v22, %v2162_v23 }
  0x30   :  { %731 = vmatpush.bf16.msrb.mxu0 %v2385_v24  ;;  %v3066_v24 = vld [vmem:[%s4800_s3 + $0x1f4] sm:$0xf]  ;;  %v2474_v29 = vld [vmem:[%s4800_s3 + $0x2f8] sm:$0xf0]  ;;  %v3080_v36 = vld [vmem:[%s4800_s3 + $0x264] sm:$0xf]  ;;  %v3816_v41 = vpack.c.b16 %v167_v30, %v167_v30 }
  0x31   :  { %782 = vmatpush.bf16.msra.mxu2 %v2205_v20  ;;  %v2353_v20 = vor.u32 %v3069_v7, %v2352_v4  ;;  %v2477_v39 = vor.u32 %v3098_v28, %v2474_v29  ;;  %v3064_v40 = vld [vmem:[%s4800_s3 + $0x1e4] sm:$0xf]  ;;  %v2338_v43 = vld [vmem:[%s4800_s3 + $0x1e8] sm:$0xf0]  ;;  %v3046_v48 = vld [vmem:[%s4800_s3 + $0x154] sm:$0xf] }
  0x32   :  { %770 = vmatpush.bf16.msrb.mxu3 %v2133_v25  ;;  %v2285_v25 = vor.u32 %v3050_v11, %v2282_v13  ;;  %v3096_v44 = vld [vmem:[%s4800_s3 + $0x2e4] sm:$0xf]  ;;  %v2266_v49 = vld [vmem:[%s4800_s3 + $0x158] sm:$0xf0]  ;;  %v2341_v52 = vor.u32 %v3064_v40, %v2338_v43  ;;  %v3062_v54 = vld [vmem:[%s4800_s3 + $0x1d4] sm:$0xf] }
  0x33   :  { %744 = vmatpush.bf16.msrb.mxu1 %v2449_v32  ;;  %v3048_v32 = vld [vmem:[%s4800_s3 + $0x164] sm:$0xf]  ;;  %v2330_v56 = vld [vmem:[%s4800_s3 + $0x1d8] sm:$0xf0]  ;;  %v3094_v57 = vld [vmem:[%s4800_s3 + $0x2d4] sm:$0xf]  ;;  %v2269_v58 = vor.u32 %v3046_v48, %v2266_v49 }
  0x34   :  { %732 = vmatpush.bf16.msrb.mxu0 %v2377_v37  ;;  %2486 = vmatmul.msk.bf16.vlgmr.msrb.gmra.mxu2 %vm672_vm0, %v3708_v46  ;;  %v2402_v37 = vld [vmem:[%s4800_s3 + $0x268] sm:$0xf0]  ;;  %v2277_v42 = vor.u32 %v3048_v32, %v2274_v33  ;;  %v3044_v61 = vld [vmem:[%s4800_s3 + $0x144] sm:$0xf] }
  0x35   :  { %783 = vmatpush.bf16.msra.mxu2 %v2197_v34  ;;  %v3805_v34 = vpack.c.b16 %v166_v19, %v166_v19  ;;  %v2258_v63 = vld [vmem:[%s4800_s3 + $0x148] sm:$0xf0] }
  0x36   :  { %771 = vmatpush.bf16.msrb.mxu3 %v2125_v38  ;;  %v2349_v38 = vor.u32 %v3066_v24, %v2346_v27 }
  0x37   :  { %745 = vmatpush.bf16.msrb.mxu1 %v2441_v45  ;;  %v2466_v45 = vld [vmem:[%s4800_s3 + $0x2e8] sm:$0xf0] }
  0x38   :  { %733 = vmatpush.bf16.msrb.mxu0 %v2369_v50  ;;  %v3078_v50 = vld [vmem:[%s4800_s3 + $0x254] sm:$0xf]  ;;  %v2469_v53 = vor.u32 %v3096_v44, %v2466_v45 }
  0x39   :  { %784 = vmatpush.bf16.msra.mxu2 %v2189_v47  ;;  %v2405_v47 = vor.u32 %v3080_v36, %v2402_v37 }
  0x3a   :  { %772 = vmatpush.bf16.msrb.mxu3 %v2117_v51  ;;  %v2394_v51 = vld [vmem:[%s4800_s3 + $0x258] sm:$0xf0] }
  0x3b   :  { %746 = vmatpush.bf16.msrb.mxu1 %v2433_v59  ;;  %v2458_v59 = vld [vmem:[%s4800_s3 + $0x2d8] sm:$0xf0] }
  0x3c   :  { %734 = vmatpush.bf16.msrb.mxu0 %v2361_v2 }
  0x3d   :  { %785 = vmatpush.bf16.msra.mxu2 %v2181_v62  ;;  %v2397_v62 = vor.u32 %v3078_v50, %v2394_v51 }
  0x3e   :  { %773 = vmatpush.bf16.msrb.mxu3 %v2109_v3 }
  0x3f   :  { %747 = vmatpush.bf16.msrb.mxu1 %v2425_v12 }
  0x40   :  { %735 = vmatpush.bf16.msrb.mxu0 %v2353_v20 }
  0x41   :  { %786 = vmatpush.bf16.msra.mxu2 %v2173_v16 }
  0x42   :  { %774 = vmatpush.bf16.msrb.mxu3 %v2101_v21 }
  0x43   :  { %748 = vmatpush.bf16.msrb.mxu1 %v2417_v31  ;;  %736 = vmatmul.bf16.vlgmr.msrb.gmra.mxu0 %v3805_v34 }
  0x44   :  { %793 = vmatpush.bf16.msra.mxu0 %v2285_v25 }
  0x45   :  { %787 = vmatpush.bf16.msra.mxu2 %v2165_v35 }
  0x46   :  { %819 = vmatpush.bf16.msra.mxu3 %v2413_v26  ;;  %749 = vmatmul.bf16.vlgmr.msrb.gmra.mxu1 %v3816_v41 }
  0x47   :  { %806 = vmatpush.bf16.msra.mxu1 %v2349_v38 }
  0x48   :  { %794 = vmatpush.bf16.msra.mxu0 %v2277_v42  ;;  %788 = vmatmul.bf16.vlgmr.msra.gmra.mxu2 %v3627_v6 }
  0x49   :  { %832 = vmatpush.bf16.msrb.mxu2 %v2477_v39 }
  0x4a   :  { %820 = vmatpush.bf16.msra.mxu3 %v2405_v47 }
  0x4b   :  { %20 = vsyncpa [#allocation3], 0  ;;  %v3076_v0 = vld [vmem:[%s4800_s3 + $0x244] sm:$0xf]  ;;  %v2386_v1 = vld [vmem:[%s4800_s3 + $0x248] sm:$0xf0]  ;;  %775 = vmatmul.bf16.vlgmr.msrb.gmra.mxu3 %v3605_v60  ;;  %807 = vmatpush.bf16.msra.mxu1 %v2341_v52  ;;  %v2333_v2 = vor.u32 %v3062_v54, %v2330_v56  ;;  %v2461_v3 = vor.u32 %v3094_v57, %v2458_v59  ;;  %v2261_v6 = vor.u32 %v3044_v61, %v2258_v63 }
  0x4c   :  { %v3060_v4 = vld [vmem:[%s4800_s3 + $0x1c4] sm:$0xf]  ;;  %795 = vmatpush.bf16.msra.mxu0 %v2269_v58  ;;  %v2322_v7 = vld [vmem:[%s4800_s3 + $0x1c8] sm:$0xf0]  ;;  %v2389_v9 = vor.u32 %v3076_v0, %v2386_v1  ;;  %v3042_v10 = vld [vmem:[%s4800_s3 + $0x134] sm:$0xf] }
  0x4d   :  { %833 = vmatpush.bf16.msrb.mxu2 %v2469_v53  ;;  %v3092_v8 = vld [vmem:[%s4800_s3 + $0x2c4] sm:$0xf]  ;;  %v2450_v60 = vld [vmem:[%s4800_s3 + $0x2c8] sm:$0xf0]  ;;  %v2250_v11 = vld [vmem:[%s4800_s3 + $0x138] sm:$0xf0]  ;;  %v2325_v14 = vor.u32 %v3060_v4, %v2322_v7 }
  0x4e   :  { %821 = vmatpush.bf16.msra.mxu3 %v2397_v62  ;;  %v3074_v12 = vld [vmem:[%s4800_s3 + $0x234] sm:$0xf]  ;;  %v2378_v13 = vld [vmem:[%s4800_s3 + $0x238] sm:$0xf0]  ;;  %v2453_v15 = vor.u32 %v3092_v8, %v2450_v60  ;;  %v2253_v17 = vor.u32 %v3042_v10, %v2250_v11  ;;  %v3040_v22 = vld [vmem:[%s4800_s3 + $0x124] sm:$0xf] }
  0x4f   :  { %808 = vmatpush.bf16.msra.mxu1 %v2333_v2  ;;  %v3058_v16 = vld [vmem:[%s4800_s3 + $0x1b4] sm:$0xf]  ;;  %v2314_v18 = vld [vmem:[%s4800_s3 + $0x1b8] sm:$0xf0]  ;;  %v2381_v21 = vor.u32 %v3074_v12, %v2378_v13  ;;  %v2242_v23 = vld [vmem:[%s4800_s3 + $0x128] sm:$0xf0] }
  0x50   :  { %796 = vmatpush.bf16.msra.mxu0 %v2261_v6  ;;  %v3090_v19 = vld [vmem:[%s4800_s3 + $0x2b4] sm:$0xf]  ;;  %v2442_v20 = vld [vmem:[%s4800_s3 + $0x2b8] sm:$0xf0]  ;;  %v3072_v24 = vld [vmem:[%s4800_s3 + $0x224] sm:$0xf]  ;;  %v2317_v26 = vor.u32 %v3058_v16, %v2314_v18  ;;  %v2245_v29 = vor.u32 %v3040_v22, %v2242_v23 }
  0x51   :  { %834 = vmatpush.bf16.msrb.mxu2 %v2461_v3  ;;  %v2370_v25 = vld [vmem:[%s4800_s3 + $0x228] sm:$0xf0]  ;;  %v2445_v27 = vor.u32 %v3090_v19, %v2442_v20  ;;  %v3056_v28 = vld [vmem:[%s4800_s3 + $0x1a4] sm:$0xf]  ;;  %v3038_v35 = vld [vmem:[%s4800_s3 + $0x114] sm:$0xf] }
  0x52   :  { %822 = vmatpush.bf16.msra.mxu3 %v2389_v9  ;;  %v2306_v30 = vld [vmem:[%s4800_s3 + $0x1a8] sm:$0xf0]  ;;  %v3088_v31 = vld [vmem:[%s4800_s3 + $0x2a4] sm:$0xf]  ;;  %v2373_v33 = vor.u32 %v3072_v24, %v2370_v25  ;;  %v2234_v36 = vld [vmem:[%s4800_s3 + $0x118] sm:$0xf0] }
  0x53   :  { %809 = vmatpush.bf16.msra.mxu1 %v2325_v14  ;;  %v2434_v32 = vld [vmem:[%s4800_s3 + $0x2a8] sm:$0xf0]  ;;  %v3070_v37 = vld [vmem:[%s4800_s3 + $0x214] sm:$0xf]  ;;  %v2362_v38 = vld [vmem:[%s4800_s3 + $0x218] sm:$0xf0]  ;;  %v2309_v39 = vor.u32 %v3056_v28, %v2306_v30  ;;  %v2237_v43 = vor.u32 %v3038_v35, %v2234_v36 }
  0x54   :  { %797 = vmatpush.bf16.msra.mxu0 %v2253_v17  ;;  %v2437_v40 = vor.u32 %v3088_v31, %v2434_v32  ;;  %v3054_v42 = vld [vmem:[%s4800_s3 + $0x194] sm:$0xf]  ;;  %v2298_v44 = vld [vmem:[%s4800_s3 + $0x198] sm:$0xf0]  ;;  %v2365_v48 = vor.u32 %v3070_v37, %v2362_v38  ;;  %v3036_v49 = vld [vmem:[%s4800_s3 + $0x104] sm:$0xf] }
  0x55   :  { %835 = vmatpush.bf16.msrb.mxu2 %v2453_v15  ;;  %v3086_v45 = vld [vmem:[%s4800_s3 + $0x294] sm:$0xf]  ;;  %v2426_v47 = vld [vmem:[%s4800_s3 + $0x298] sm:$0xf0]  ;;  %v2226_v50 = vld [vmem:[%s4800_s3 + $0x108] sm:$0xf0]  ;;  %v2301_v56 = vor.u32 %v3054_v42, %v2298_v44 }
  0x56   :  { %823 = vmatpush.bf16.msra.mxu3 %v2381_v21  ;;  %v3068_v51 = vld [vmem:[%s4800_s3 + $0x204] sm:$0xf]  ;;  %v2354_v52 = vld [vmem:[%s4800_s3 + $0x208] sm:$0xf0]  ;;  %v2429_v57 = vor.u32 %v3086_v45, %v2426_v47  ;;  %v2229_v58 = vor.u32 %v3036_v49, %v2226_v50  ;;  %v3109_v4 = vld [vmem:[%s4802_s5 + $0x38] sm:$0xff]  ;;  %s3278_s20 = smov 8  }
  0x57   :  { %810 = vmatpush.bf16.msra.mxu1 %v2317_v26  ;;  %v3100_v53 = vld [vmem:[%s4800_s3 + $0x304] sm:$0xf]  ;;  %v2482_v54 = vld [vmem:[%s4800_s3 + $0x308] sm:$0xf0]  ;;  %v2357_v62 = vor.u32 %v3068_v51, %v2354_v52  ;;  %v3108_v6 = vld [vmem:[%s4802_s5 + $0x30] sm:$0xff]  ;;  %vm1038_vm1 = vcmask 1041408  }
  0x58   :  { %798 = vmatpush.bf16.msra.mxu0 %v2245_v29  ;;  %v3052_v59 = vld [vmem:[%s4800_s3 + $0x184] sm:$0xf]  ;;  %v2290_v61 = vld [vmem:[%s4800_s3 + $0x188] sm:$0xf0]  ;;  %v2485_v1 = vor.u32 %v3100_v53, %v2482_v54  ;;  %v152_v10 = vld [vmem:[%s4801_s4] sm:$0x3] }
  0x59   :  { %836 = vmatpush.bf16.msrb.mxu2 %v2445_v27  ;;  %v3084_v63 = vld [vmem:[%s4800_s3 + $0x284] sm:$0xf]  ;;  %v2418_v0 = vld [vmem:[%s4800_s3 + $0x288] sm:$0xf0]  ;;  %v2293_v2 = vor.u32 %v3052_v59, %v2290_v61  ;;  %v3117_v13 = vld [vmem:[%s4802_s5 + $0x78] sm:$0xff]  ;;  %v154_v15 = vperm.slane %v152_v10, 0 }
  0x5a   :  { %824 = vmatpush.bf16.msra.mxu3 %v2373_v33  ;;  %v2421_v3 = vor.u32 %v3084_v63, %v2418_v0  ;;  %v3102_v60 = vld [vmem:[%s4802_s5] sm:$0xff]  ;;  %v3116_v17 = vld [vmem:[%s4802_s5 + $0x70] sm:$0xff]  ;;  %v3115_v23 = vld [vmem:[%s4802_s5 + $0x68] sm:$0xff]  ;;  %vm1025_vm2 = vcmask 64512   ;;  %vm1034_vm3 = vcmask 146432   ;;  %s3280_s25 = smov 120  }
  0x5b   :  { %811 = vmatpush.bf16.msra.mxu1 %v2309_v39  ;;  %v3114_v26 = vld [vmem:[%s4802_s5 + $0x60] sm:$0xff]  ;;  %v3113_v31 = vld [vmem:[%s4802_s5 + $0x58] sm:$0xff]  ;;  %v3112_v36 = vld [vmem:[%s4802_s5 + $0x50] sm:$0xff]  ;;  %vm1093_vm4 = vcmask 1043456   ;;  %vm2072_vm5 = vcmask 195584  }
  0x5c   :  { %799 = vmatpush.bf16.msra.mxu0 %v2237_v43  ;;  %v3111_v42 = vld [vmem:[%s4802_s5 + $0x48] sm:$0xff]  ;;  %v3110_v43 = vld [vmem:[%s4802_s5 + $0x40] sm:$0xff] }
  0x5d   :  { %837 = vmatpush.bf16.msrb.mxu2 %v2437_v40  ;;  %v52_v47 = vld [vmem:[%s4798_s1] sm:$0xff] }
  0x5e   :  { %825 = vmatpush.bf16.msra.mxu3 %v2365_v48  ;;  %v155_v48 = vperm.slane %v152_v10, 1  ;;  %1022 = vrot.lane.b32.xlu0 %v52_v47, %s3278_s20 }
  0x5f   :  { %812 = vmatpush.bf16.msra.mxu1 %v2301_v56 }
  0x60   :  { %800 = vmatpush.bf16.msra.mxu0 %v2229_v58 }
  0x61   :  { %838 = vmatpush.bf16.msrb.mxu2 %v2429_v57 }
  0x62   :  { %826 = vmatpush.bf16.msra.mxu3 %v2357_v62 }
  0x63   :  { %813 = vmatpush.bf16.msra.mxu1 %v2293_v2  ;;  %801 = vmatmul.bf16.vlgmr.msra.gmra.mxu0 %v3597_v55  ;;  %v3107_v55 = vld [vmem:[%s4802_s5 + $0x28] sm:$0xff] }
  0x64   :  { %852 = vmatpush.bf16.msrb.mxu0 %v2485_v1 }
  0x65   :  { %827 = vmatmul.bf16.vlgmr.msra.gmra.mxu3 %v3805_v34  ;;  %839 = vmatpush.bf16.msrb.mxu2 %v2421_v3  ;;  %v3104_v34 = vld [vmem:[%s4802_s5 + $0x10] sm:$0xff] }
  0x66   :  { %814 = vmatmul.bf16.vlgmr.msra.gmra.mxu1 %v3625_v5  ;;  %v3106_v5 = vld [vmem:[%s4802_s5 + $0x20] sm:$0xff]  ;;  %1007 = vmatpush.bf16.msrb.mxu3 %v3117_v13 }
  0x67   :  { %994 = vmatpush.bf16.msrb.mxu1 %v3109_v4 }
  0x68   :  { %840 = vmatmul.bf16.vlgmr.msrb.gmra.mxu2 %v3816_v41  ;;  %v3103_v41 = vld [vmem:[%s4802_s5 + $0x8] sm:$0xff] }
  0x6a   :  { %1008 = vmatpush.bf16.msrb.mxu3 %v3116_v17 }
  0x6b   :  { %995 = vmatpush.bf16.msrb.mxu1 %v3108_v6 }
  0x6e   :  { %1009 = vmatpush.bf16.msrb.mxu3 %v3115_v23 }
  0x6f   :  { %996 = vmatpush.bf16.msrb.mxu1 %v3107_v55 }
  0x72   :  { %1010 = vmatpush.bf16.msrb.mxu3 %v3114_v26 }
  0x73   :  { %2487 = vmatmul.msk.bf16.vlgmr.msrb.gmra.mxu0 %vm672_vm0, %v3708_v46  ;;  %997 = vmatpush.bf16.msrb.mxu1 %v3106_v5  ;;  %v3105_v46 = vld [vmem:[%s4802_s5 + $0x18] sm:$0xff] }
  0x76   :  { %1011 = vmatpush.bf16.msrb.mxu3 %v3113_v31 }
  0x77   :  { %998 = vmatpush.bf16.msrb.mxu1 %v3105_v46  ;;  %v1029_v46 = vld [vmem:[%s4804_s7 + $0x10] sm:$0x3] }
  0x78   :  { %2552 = vmatpush.msk.msra.mxu0 %vm1038_vm1, %v1029_v46 }
  0x7a   :  { %1012 = vmatpush.bf16.msrb.mxu3 %v3112_v36 }
  0x7b   :  { %999 = vmatpush.bf16.msrb.mxu1 %v3104_v34  ;;  %v1028_v34 = vld [vmem:[%s4804_s7 + $0x8] sm:$0xff] }
  0x7c   :  { %1056 = vmatpush.msra.mxu0 %v1028_v34  ;;  %v2670_v34 = vld [vmem:[%s4808_s11 + $0xe0] sm:$0xf] }
  0x7e   :  { %1013 = vmatpush.bf16.msrb.mxu3 %v3111_v42  ;;  %v3170_v42 = vld [vmem:[%s4808_s11 + $0x1a0] sm:$0xf0] }
  0x7f   :  { %1000 = vmatpush.bf16.msrb.mxu1 %v3103_v41  ;;  %v1027_v41 = vld [vmem:[%s4804_s7] sm:$0xff] }
  0x80   :  { %1057 = vmatpush.msra.mxu0 %v1027_v41 }
  0x82   :  { %1014 = vmatpush.bf16.msrb.mxu3 %v3110_v43  ;;  %v3167_v43 = vld [vmem:[%s4808_s11 + $0x18c] sm:$0xf] }
  0x83   :  { %1001 = vmatpush.bf16.msrb.mxu1 %v3102_v60 }
  0xa0   :  { %v685_v7 = vpop.f32.mrf.mxu0 }
  0xa1   :  { %v686_v18 = vadd.f32 %v685_v7, %v154_v15  ;;  %v3234_v7 = vld [vmem:[%s4803_s6] ss:$0 sm:$0xff]  ;;  %s3279_s6 = smov 112  }
  0xa3   :  { %v698_v8 = vpop.f32.mrf.mxu1 }
  0xa4   :  { %v699_v20 = vadd.f32 %v698_v8, %v686_v18 }
  0xa7   :  { %v711_v9 = vpop.f32.mrf.mxu2 }
  0xa8   :  { %v724_v11 = vpop.f32.mrf.mxu3  ;;  %v687_v12 = vpop.f32.mrf.mxu0  ;;  %v712_v22 = vadd.f32 %v711_v9, %v699_v20 }
  0xaa   :  { %v725_v24 = vadd.f32 %v724_v11, %v712_v22 }
  0xab   :  { %v700_v14 = vpop.f32.mrf.mxu1 }
  0xac   :  { %v3235_v14 = vld [vmem:[%s4805_s8] ss:$0 sm:$0xff]  ;;  %s2083_s8 = sshll.u32 %s4811_s14, 4  ;;  %s2084_s8 = int_to_ptr.hbm [resolvable:$true] %s2083_s8 }
  0xaf   :  { %v713_v16 = vpop.f32.mrf.mxu2 }
  0xb0   :  { %v726_v19 = vpop.f32.mrf.mxu3 }
  0xb7   :  { %v763_v21 = vpop.f32.mrf.mxu2 }
  0xbf   :  { %v765_v28 = vpop.f32.mrf.mxu2 }
  0xc0   :  { %v737_v25 = vpop.f32.mrf.mxu0  ;;  %v2978_v28 = vld [vmem:[%s4808_s11 + $0x348] sm:$0xf] }
  0xc1   :  { %v738_v27 = vadd.f32 %v737_v25, %v725_v24 }
  0xc3   :  { %v750_v29 = vpop.f32.mrf.mxu1 }
  0xc4   :  { %v751_v30 = vadd.f32 %v750_v29, %v738_v27  ;;  %v3226_v29 = vld [vmem:[%s4808_s11 + $0x360] sm:$0xf0] }
  0xc5   :  { %v2979_v31 = vor.u32 %v3226_v29, %v2978_v28  ;;  %v3188_v28 = vld [vmem:[%s4808_s11 + $0x234] sm:$0xf]  ;;  %v2840_v29 = vld [vmem:[%s4808_s11 + $0x24c] sm:$0xf0] }
  0xc6   :  { %v764_v32 = vadd.f32 %v763_v21, %v751_v30  ;;  %v1078_v21 = vld [vmem:[%s4806_s9] sm:$0xff]  ;;  %v3223_v30 = vld [vmem:[%s4808_s11 + $0x34c] sm:$0xf] }
  0xc7   :  { %v1086_v22 = vunpack.c.l.b16 %v1078_v21  ;;  %v1087_v23 = vunpack.c.h.b16 %v1078_v21 }
  0xc8   :  { %v858_v33 = vmax.f32 %v764_v32, 0.0  ;;  %v739_v35 = vpop.f32.mrf.mxu0  ;;  %v2980_v32 = vld [vmem:[%s4808_s11 + $0x364] sm:$0xf0] }
  0xc9   :  { %v1088_v24 = vpack.c.b16 %v1086_v22, %v1086_v22  ;;  %v1089_v25 = vpack.c.b16 %v1087_v23, %v1087_v23  ;;  %v3219_v35 = vld [vmem:[%s4808_s11 + $0x328] sm:$0xf0]  ;;  %v2983_v36 = vor.u32 %v3223_v30, %v2980_v32  ;;  %v3142_v22 = vld [vmem:[%s4808_s11 + $0xc0] sm:$0xf0]  ;;  %v2614_v32 = vld [vmem:[%s4808_s11 + $0x70] sm:$0xf] }
  0xca   :  { %v860_v37 = vpack.c.bf16 %v858_v33, %v858_v33  ;;  %v2950_v33 = vld [vmem:[%s4808_s11 + $0x310] sm:$0xf]  ;;  %v3139_v23 = vld [vmem:[%s4808_s11 + $0xac] sm:$0xf] }
  0xcb   :  { %v789_v38 = vpop.f32.mrf.mxu2  ;;  %v752_v40 = vpop.f32.mrf.mxu1  ;;  %v1095_v26 = vsel %vm1093_vm4, %v1088_v24, 0  ;;  %v1098_v27 = vsel %vm1093_vm4, %v1089_v25, 0  ;;  %v2644_v24 = vld [vmem:[%s4808_s11 + $0xc4] sm:$0xf0] }
  0xcc   :  { %1002 = vmatmul.bf16.vlgmr.msrb.gmra.mxu1 %v860_v37  ;;  %1107 = vmatpush.bf16.msra.mxu2 %v1095_v26  ;;  %v3216_v37 = vld [vmem:[%s4808_s11 + $0x314] sm:$0xf]  ;;  %v2951_v40 = vor.u32 %v3219_v35, %v2950_v33  ;;  %v2838_v26 = vld [vmem:[%s4808_s11 + $0x230] sm:$0xf]  ;;  %v3135_v35 = vld [vmem:[%s4808_s11 + $0x88] sm:$0xf0] }
  0xcd   :  { %1120 = vmatpush.bf16.msrb.mxu0 %v1098_v27  ;;  %v3191_v27 = vld [vmem:[%s4808_s11 + $0x248] sm:$0xf0] }
  0xce   :  { %v776_v39 = vpop.f32.mrf.mxu3  ;;  %v2839_v33 = vor.u32 %v3191_v27, %v2838_v26  ;;  %v3161_v27 = vld [vmem:[%s4808_s11 + $0x15c] sm:$0xf] }
  0xcf   :  { %v777_v49 = vadd.f32 %v776_v39, %v155_v48  ;;  %v2754_v39 = vld [vmem:[%s4808_s11 + $0x188] sm:$0xf] }
  0xd0   :  { %v1023_v10 = vpop.permute.xlu0 %1022  ;;  %1863 = vmatpush.bf16.msrb.mxu2 %v2979_v31  ;;  %v2755_v47 = vor.u32 %v3170_v42, %v2754_v39  ;;  %v2647_v31 = vor.u32 %v3139_v23, %v2644_v24  ;;  %v2810_v39 = vld [vmem:[%s4808_s11 + $0x1f8] sm:$0xf]  ;;  %v53_v42 = vld [vmem:[%s4799_s2] sm:$0xff] }
  0xd1   :  { %v790_v51 = vadd.f32 %v789_v38, %v777_v49  ;;  %v2952_v38 = vld [vmem:[%s4808_s11 + $0x32c] sm:$0xf0]  ;;  %v2922_v49 = vld [vmem:[%s4808_s11 + $0x2d8] sm:$0xf] }
  0xd2   :  { %1850 = vmatpush.bf16.msra.mxu1 %v2755_v47  ;;  %v2615_v47 = vor.u32 %v3135_v35, %v2614_v32  ;;  %v2734_v24 = vld [vmem:[%s4808_s11 + $0x158] sm:$0xf]  ;;  %v3210_v32 = vld [vmem:[%s4808_s11 + $0x2e4] sm:$0xf] }
  0xd3   :  { %v791_v44 = vpop.f32.mrf.mxu2 }
  0xd4   :  { %v2756_v44 = vld [vmem:[%s4808_s11 + $0x1a4] sm:$0xf0]  ;;  %1864 = vmatpush.bf16.msrb.mxu2 %v2951_v40  ;;  %v3184_v40 = vld [vmem:[%s4808_s11 + $0x210] sm:$0xf0] }
  0xd5   :  { %v2759_v48 = vor.u32 %v3167_v43, %v2756_v44  ;;  %v3181_v43 = vld [vmem:[%s4808_s11 + $0x1fc] sm:$0xf]  ;;  %v2812_v44 = vld [vmem:[%s4808_s11 + $0x214] sm:$0xf0] }
  0xd6   :  { %v778_v45 = vpop.f32.mrf.mxu3 }
  0xd7   :  { %v2955_v45 = vor.u32 %v3216_v37, %v2952_v38  ;;  %1876 = vmatpush.bf16.msra.mxu3 %v2759_v48  ;;  %v2616_v37 = vld [vmem:[%s4808_s11 + $0x8c] sm:$0xf0]  ;;  %v2843_v38 = vor.u32 %v3188_v28, %v2840_v29  ;;  %v2736_v28 = vld [vmem:[%s4808_s11 + $0x174] sm:$0xf0] }
  0xe0   :  { %v802_v50 = vpop.f32.mrf.mxu0 }
  0xe1   :  { %v803_v53 = vadd.f32 %v802_v50, %v790_v51  ;;  %v3212_v50 = vld [vmem:[%s4808_s11 + $0x2f0] sm:$0xf0]  ;;  %v3209_v51 = vld [vmem:[%s4808_s11 + $0x2dc] sm:$0xf] }
  0xe3   :  { %v815_v52 = vpop.f32.mrf.mxu1 }
  0xe4   :  { %v816_v57 = vadd.f32 %v815_v52, %v803_v53  ;;  %v2924_v52 = vld [vmem:[%s4808_s11 + $0x2f4] sm:$0xf0]  ;;  %v2726_v53 = vld [vmem:[%s4808_s11 + $0x150] sm:$0xf] }
  0xe8   :  { %v828_v54 = vpop.f32.mrf.mxu3  ;;  %v804_v56 = vpop.f32.mrf.mxu0 }
  0xe9   :  { %v829_v59 = vadd.f32 %v828_v54, %v816_v57  ;;  %v3163_v54 = vld [vmem:[%s4808_s11 + $0x168] sm:$0xf0]  ;;  %v3160_v57 = vld [vmem:[%s4808_s11 + $0x154] sm:$0xf] }
  0xea   :  { %v2727_v56 = vor.u32 %v3163_v54, %v2726_v53  ;;  %v3128_v53 = vld [vmem:[%s4808_s11 + $0x50] sm:$0xf0]  ;;  %v3125_v54 = vld [vmem:[%s4808_s11 + $0x3c] sm:$0xf] }
  0xeb   :  { %v841_v58 = vpop.f32.mrf.mxu2  ;;  %v817_v61 = vpop.f32.mrf.mxu1 }
  0xec   :  { %v842_v62 = vadd.f32 %v841_v58, %v829_v59  ;;  %v2728_v58 = vld [vmem:[%s4808_s11 + $0x16c] sm:$0xf0]  ;;  %v2923_v59 = vor.u32 %v3212_v50, %v2922_v49  ;;  %1851 = vmatpush.bf16.msra.mxu1 %v2727_v56  ;;  %v2586_v49 = vld [vmem:[%s4808_s11 + $0x38] sm:$0xf] }
  0xed   :  { %v2731_v61 = vor.u32 %v3160_v57, %v2728_v58  ;;  %v2588_v56 = vld [vmem:[%s4808_s11 + $0x54] sm:$0xf0]  ;;  %v2782_v57 = vld [vmem:[%s4808_s11 + $0x1c0] sm:$0xf]  ;;  %v3177_v58 = vld [vmem:[%s4808_s11 + $0x1d8] sm:$0xf0] }
  0xee   :  { %1865 = vmatpush.bf16.msrb.mxu2 %v2923_v59  ;;  %v3174_v59 = vld [vmem:[%s4808_s11 + $0x1c4] sm:$0xf] }
  0xef   :  { %1877 = vmatpush.bf16.msra.mxu3 %v2731_v61  ;;  %v2784_v61 = vld [vmem:[%s4808_s11 + $0x1dc] sm:$0xf0] }
  0xf0   :  { %v830_v63 = vpop.f32.mrf.mxu3  ;;  %v854_v0 = vpop.f32.mrf.mxu0 }
  0xf1   :  { %v855_v1 = vadd.f32 %v854_v0, %v842_v62  ;;  %v2894_v62 = vld [vmem:[%s4808_s11 + $0x2a0] sm:$0xf]  ;;  %v3205_v63 = vld [vmem:[%s4808_s11 + $0x2b8] sm:$0xf0]  ;;  %v2927_v0 = vor.u32 %v3209_v51, %v2924_v52  ;;  %v2811_v52 = vor.u32 %v3184_v40, %v2810_v39  ;;  %v3154_v40 = vld [vmem:[%s4808_s11 + $0x124] sm:$0xf] }
  0xf2   :  { %v2895_v41 = vor.u32 %v3205_v63, %v2894_v62  ;;  %v2986_v62 = vld [vmem:[%s4808_s11 + $0x350] sm:$0xf] }
  0xf3   :  { %v843_v2 = vpop.f32.mrf.mxu2  ;;  %v859_v3 = vmax.f32 %v855_v1, 0.0  ;;  %v2698_v1 = vld [vmem:[%s4808_s11 + $0x118] sm:$0xf] }
  0xf4   :  { %v3156_v2 = vld [vmem:[%s4808_s11 + $0x130] sm:$0xf0]  ;;  %1866 = vmatpush.bf16.msrb.mxu2 %v2895_v41  ;;  %v2762_v41 = vld [vmem:[%s4808_s11 + $0x190] sm:$0xf] }
  0xf5   :  { %v861_v4 = vpack.c.bf16 %v859_v3, %v859_v3  ;;  %v3153_v3 = vld [vmem:[%s4808_s11 + $0x11c] sm:$0xf] }
  0xf7   :  { %1015 = vmatmul.bf16.vlgmr.msrb.gmra.mxu3 %v861_v4  ;;  %v3202_v4 = vld [vmem:[%s4808_s11 + $0x2a4] sm:$0xf] }
  0xf8   :  { %v856_v6 = vpop.f32.mrf.mxu0 }
  0xf9   :  { %v2896_v6 = vld [vmem:[%s4808_s11 + $0x2bc] sm:$0xf0] }
 0x149   :  { %v1003_v55 = vpop.f32.mrf.mxu1 }
 0x14a   :  { %v1004_v8 = vadd.f32 %v3234_v7, %v1003_v55  ;;  %v2700_v55 = vld [vmem:[%s4808_s11 + $0x134] sm:$0xf0]  ;;  %v3149_v7 = vld [vmem:[%s4808_s11 + $0xf8] sm:$0xf0] }
 0x14b   :  { %v2703_v46 = vor.u32 %v3153_v3, %v2700_v55  ;;  %v2988_v3 = vld [vmem:[%s4808_s11 + $0x36c] sm:$0xf0]  ;;  %v3121_v55 = vld [vmem:[%s4808_s11 + $0x18] sm:$0xf0] }
 0x14d   :  { %1878 = vmatpush.bf16.msra.mxu3 %v2703_v46 }
 0x151   :  { %v1005_v5 = vpop.f32.mrf.mxu1 }
 0x152   :  { %v2699_v5 = vor.u32 %v3156_v2, %v2698_v1  ;;  %v2587_v1 = vor.u32 %v3128_v53, %v2586_v49  ;;  %v3224_v2 = vld [vmem:[%s4808_s11 + $0x354] sm:$0xf] }
 0x154   :  { %1852 = vmatpush.bf16.msra.mxu1 %v2699_v5  ;;  %v3118_v5 = vld [vmem:[%s4808_s11 + $0x4] sm:$0xf] }
 0x17a   :  { %v1016_v60 = vpop.f32.mrf.mxu3 }
 0x17b   :  { %v4054_v9 = vadd.f32 %v1016_v60, %v1004_v8  ;;  %v3146_v8 = vld [vmem:[%s4808_s11 + $0xe4] sm:$0xf]  ;;  %v2672_v60 = vld [vmem:[%s4808_s11 + $0xfc] sm:$0xf0] }
 0x17d   :  { %v1020_v11 = vmax.f32 %v4054_v9, 0.0 }
 0x17f   :  { %v1026_v12 = vsel %vm1025_vm2, %v1020_v11, %v1023_v10  ;;  %v2899_v10 = vor.u32 %v3202_v4, %v2896_v6  ;;  %v2591_v4 = vor.u32 %v3125_v54, %v2588_v56  ;;  %v2783_v6 = vor.u32 %v3177_v58, %v2782_v57  ;;  %v3147_v54 = vld [vmem:[%s4808_s11 + $0xec] sm:$0xf]  ;;  %v2680_v56 = vld [vmem:[%s4808_s11 + $0x104] sm:$0xf0]  ;;  %v3196_v58 = vld [vmem:[%s4808_s11 + $0x274] sm:$0xf] }
 0x180   :  { %2553 = vmatmul.msk.f32.vlgmr.msra.gmra.mxu0 %vm1034_vm3, %v1026_v12  ;;  %v2866_v12 = vld [vmem:[%s4808_s11 + $0x268] sm:$0xf]  ;;  %v3199_v57 = vld [vmem:[%s4808_s11 + $0x288] sm:$0xf0] }
 0x181   :  { %1889 = vmatpush.bf16.msra.mxu0 %v2983_v36  ;;  %v3132_v36 = vld [vmem:[%s4808_s11 + $0x74] sm:$0xf] }
 0x182   :  { %v1018_v13 = vpop.f32.mrf.mxu3  ;;  %v2619_v48 = vor.u32 %v3132_v36, %v2616_v37  ;;  %v2739_v36 = vor.u32 %v3161_v27, %v2736_v28  ;;  %v2706_v37 = vld [vmem:[%s4808_s11 + $0x120] sm:$0xf] }
 0x183   :  { %v3198_v13 = vld [vmem:[%s4808_s11 + $0x280] sm:$0xf0]  ;;  %v2594_v28 = vld [vmem:[%s4808_s11 + $0x40] sm:$0xf] }
 0x184   :  { %v2867_v21 = vor.u32 %v3198_v13, %v2866_v12  ;;  %v2764_v12 = vld [vmem:[%s4808_s11 + $0x1ac] sm:$0xf0] }
 0x185   :  { %1890 = vmatpush.bf16.msra.mxu0 %v2955_v45 }
 0x186   :  { %1867 = vmatpush.bf16.msrb.mxu2 %v2867_v21 }
 0x189   :  { %1891 = vmatpush.bf16.msra.mxu0 %v2927_v0  ;;  %v3227_v0 = vld [vmem:[%s4808_s11 + $0x368] sm:$0xf0] }
 0x18a   :  { %1868 = vmatpush.bf16.msrb.mxu2 %v2839_v33  ;;  %v2932_v33 = vld [vmem:[%s4808_s11 + $0x2fc] sm:$0xf0] }
 0x18d   :  { %1892 = vmatpush.bf16.msra.mxu0 %v2899_v10  ;;  %v3168_v10 = vld [vmem:[%s4808_s11 + $0x194] sm:$0xf] }
 0x18e   :  { %1869 = vmatpush.bf16.msrb.mxu2 %v2811_v52  ;;  %v2767_v23 = vor.u32 %v3168_v10, %v2764_v12  ;;  %v3150_v52 = vld [vmem:[%s4808_s11 + $0x100] sm:$0xf0] }
 0x18f   :  { %v3182_v12 = vld [vmem:[%s4808_s11 + $0x204] sm:$0xf] }
 0x192   :  { %1870 = vmatpush.bf16.msrb.mxu2 %v2783_v6 }
 0x1fd   :  { %v1059_v15 = vpop.f32.mrf.mxu0 }
 0x1fe   :  { %v4063_v16 = vadd.f32 %v3235_v14, %v1059_v15  ;;  %v3195_v14 = vld [vmem:[%s4808_s11 + $0x26c] sm:$0xf]  ;;  %v2868_v15 = vld [vmem:[%s4808_s11 + $0x284] sm:$0xf0] }
 0x1ff   :  { %v2871_v25 = vor.u32 %v3195_v14, %v2868_v15  ;;  %v2991_v14 = vor.u32 %v3224_v2, %v2988_v3  ;;  %v2958_v15 = vld [vmem:[%s4808_s11 + $0x318] sm:$0xf]  ;;  %v3192_v2 = vld [vmem:[%s4808_s11 + $0x250] sm:$0xf0]  ;;  %v3189_v3 = vld [vmem:[%s4808_s11 + $0x23c] sm:$0xf] }
 0x200   :  { %v1063_v17 = vmul.f32 0.5, %v4063_v16  ;;  %v1062_v18 = vmax.f32 %v4063_v16, 0.0 }
 0x201   :  { %1893 = vmatpush.bf16.msra.mxu0 %v2871_v25  ;;  %v3164_v25 = vld [vmem:[%s4808_s11 + $0x170] sm:$0xf0] }
 0x202   :  { %v1064_v19 = vmul.f32 1.442695, %v1063_v17  ;;  %1073 = vrot.lane.b32.xlu1 %v1062_v18, %s3279_s6  ;;  %v2671_v18 = vor.u32 %v3149_v7, %v2670_v34  ;;  %v2560_v34 = vld [vmem:[%s4808_s11 + $0x1c] sm:$0xf0]  ;;  %v3171_v7 = vld [vmem:[%s4808_s11 + $0x1a8] sm:$0xf0]  ;;  %v2735_v35 = vor.u32 %v3164_v25, %v2734_v24 }
 0x203   :  { %v2563_v21 = vor.u32 %v3118_v5, %v2560_v34  ;;  %v3143_v5 = vld [vmem:[%s4808_s11 + $0xc8] sm:$0xf0]  ;;  %v3140_v34 = vld [vmem:[%s4808_s11 + $0xb4] sm:$0xf] }
 0x204   :  { %3236 = vpow2.f32 %v1064_v19  ;;  %v2675_v19 = vor.u32 %v3146_v8, %v2672_v60  ;;  %1853 = vmatpush.bf16.msra.mxu1 %v2671_v18  ;;  %v2787_v8 = vor.u32 %v3174_v59, %v2784_v61  ;;  %v2987_v60 = vor.u32 %v3227_v0, %v2986_v62  ;;  %v2876_v59 = vld [vmem:[%s4808_s11 + $0x28c] sm:$0xf0]  ;;  %v3175_v25 = vld [vmem:[%s4808_s11 + $0x1cc] sm:$0xf] }
 0x205   :  { %1894 = vmatpush.bf16.msra.mxu0 %v2843_v38  ;;  %v3157_v38 = vld [vmem:[%s4808_s11 + $0x138] sm:$0xf0]  ;;  %v2683_v62 = vor.u32 %v3147_v54, %v2680_v56  ;;  %v2879_v0 = vor.u32 %v3196_v58, %v2876_v59  ;;  %v2966_v56 = vld [vmem:[%s4808_s11 + $0x320] sm:$0xf] }
 0x206   :  { %1879 = vmatpush.bf16.msra.mxu3 %v2675_v19  ;;  %v3217_v19 = vld [vmem:[%s4808_s11 + $0x31c] sm:$0xf]  ;;  %v2707_v49 = vor.u32 %v3157_v38, %v2706_v37  ;;  %v3119_v38 = vld [vmem:[%s4808_s11 + $0xc] sm:$0xf]  ;;  %v2968_v58 = vld [vmem:[%s4808_s11 + $0x33c] sm:$0xf0] }
 0x20a   :  { %v3237_v20 = vpop.eup %3236  ;;  %2068 = vrot.lane.b32.xlu1 %v4063_v16, %s3278_s20  ;;  %1880 = vmatpush.bf16.msra.mxu3 %v2647_v31  ;;  %v3213_v31 = vld [vmem:[%s4808_s11 + $0x2f8] sm:$0xf0] }
 0x20b   :  { %1067 = vrot.lane.b32.xlu0 %v3237_v20, %s3280_s25  ;;  %v2642_v20 = vld [vmem:[%s4808_s11 + $0xa8] sm:$0xf] }
 0x20c   :  { %v2643_v30 = vor.u32 %v3142_v22, %v2642_v20  ;;  %v2960_v20 = vld [vmem:[%s4808_s11 + $0x334] sm:$0xf0]  ;;  %v2763_v22 = vor.u32 %v3171_v7, %v2762_v41  ;;  %v2652_v41 = vld [vmem:[%s4808_s11 + $0xcc] sm:$0xf0] }
 0x20d   :  { %v2963_v29 = vor.u32 %v3217_v19, %v2960_v20  ;;  %v2655_v7 = vor.u32 %v3140_v34, %v2652_v41  ;;  %v3133_v19 = vld [vmem:[%s4808_s11 + $0x7c] sm:$0xf]  ;;  %v2624_v20 = vld [vmem:[%s4808_s11 + $0x94] sm:$0xf0] }
 0x20e   :  { %1854 = vmatpush.bf16.msra.mxu1 %v2643_v30  ;;  %1881 = vmatpush.bf16.msra.mxu3 %v2619_v48  ;;  %v2930_v30 = vld [vmem:[%s4808_s11 + $0x2e0] sm:$0xf]  ;;  %v2904_v48 = vld [vmem:[%s4808_s11 + $0x2c4] sm:$0xf0] }
 0x20f   :  { %v2931_v39 = vor.u32 %v3213_v31, %v2930_v30  ;;  %v3126_v31 = vld [vmem:[%s4808_s11 + $0x44] sm:$0xf] }
 0x212   :  { %1855 = vmatpush.bf16.msra.mxu1 %v2615_v47  ;;  %1882 = vmatpush.bf16.msra.mxu3 %v2591_v4  ;;  %v3203_v47 = vld [vmem:[%s4808_s11 + $0x2ac] sm:$0xf]  ;;  %v2848_v4 = vld [vmem:[%s4808_s11 + $0x254] sm:$0xf0] }
 0x216   :  { %1856 = vmatpush.bf16.msra.mxu1 %v2587_v1  ;;  %1883 = vmatpush.bf16.msra.mxu3 %v2563_v21  ;;  %v2846_v1 = vld [vmem:[%s4808_s11 + $0x238] sm:$0xf]  ;;  %v2627_v21 = vor.u32 %v3133_v19, %v2624_v20  ;;  %v2912_v19 = vld [vmem:[%s4808_s11 + $0x2cc] sm:$0xf0] }
 0x217   :  { %v2847_v6 = vor.u32 %v3192_v2, %v2846_v1  ;;  %v2772_v1 = vld [vmem:[%s4808_s11 + $0x1b4] sm:$0xf0] }
 0x21a   :  { %1928 = vmatpush.bf16.msrb.mxu3 %v2767_v23  ;;  %v3178_v23 = vld [vmem:[%s4808_s11 + $0x1e0] sm:$0xf0] }
 0x21e   :  { %1929 = vmatpush.bf16.msrb.mxu3 %v2739_v36  ;;  %v3122_v36 = vld [vmem:[%s4808_s11 + $0x20] sm:$0xf0] }
 0x274   :  { %v4180_v17 = vpop.permute.xlu1 %1073 }
 0x27c   :  { %v2069_v45 = vpop.permute.xlu1 %2068 }
 0x27d   :  { %v2071_v50 = vsel %vm1025_vm2, %v1020_v11, %v2069_v45  ;;  %v1068_v51 = vpop.permute.xlu0 %1067  ;;  %v2815_v11 = vor.u32 %v3181_v43, %v2812_v44  ;;  %v2935_v43 = vor.u32 %v3210_v32, %v2932_v33  ;;  %v2902_v44 = vld [vmem:[%s4808_s11 + $0x2a8] sm:$0xf]  ;;  %v3206_v45 = vld [vmem:[%s4808_s11 + $0x2c0] sm:$0xf0]  ;;  %v2596_v32 = vld [vmem:[%s4808_s11 + $0x5c] sm:$0xf0] }
 0x27e   :  { %2073 = vst.msk [vmem:[%s4810_s13] sm:$0xff] %vm2072_vm5, %v2071_v50  ;;  %v1070_v9 = vmul.f32 %v1068_v51, %v53_v42  ;;  %v2708_v42 = vld [vmem:[%s4808_s11 + $0x13c] sm:$0xf0]  ;;  %v2678_v51 = vld [vmem:[%s4808_s11 + $0xe8] sm:$0xf]  ;;  %v2903_v53 = vor.u32 %v3206_v45, %v2902_v44  ;;  %v2599_v33 = vor.u32 %v3126_v31, %v2596_v32 }
 0x27f   :  { %1895 = vmatpush.bf16.msra.mxu0 %v2815_v11  ;;  %v2711_v50 = vor.u32 %v3154_v40, %v2708_v42  ;;  %v2874_v11 = vld [vmem:[%s4808_s11 + $0x270] sm:$0xf]  ;;  %v2679_v61 = vor.u32 %v3150_v52, %v2678_v51  ;;  %v1079_v42 = vld [vmem:[%s4807_s10] sm:$0x3]  ;;  %v2994_v45 = vld [vmem:[%s4808_s11 + $0x358] sm:$0xf] }
 0x280   :  { %v1071_v63 = vadd.f32 %v1070_v9, %v4063_v16  ;;  %v2558_v16 = vld [vmem:[%s4808_s11] sm:$0xf]  ;;  %v2907_v9 = vor.u32 %v3203_v47, %v2904_v48  ;;  %v3228_v48 = vld [vmem:[%s4808_s11 + $0x370] sm:$0xf0]  ;;  %v1081_v52 = vperm.slane %v1079_v42, 0 }
 0x281   :  { %v2559_v18 = vor.u32 %v3121_v55, %v2558_v16  ;;  %1930 = vmatpush.bf16.msrb.mxu3 %v2711_v50  ;;  %v2851_v16 = vor.u32 %v3189_v3, %v2848_v4  ;;  %v2650_v55 = vld [vmem:[%s4808_s11 + $0xb0] sm:$0xf]  ;;  %v2996_v50 = vld [vmem:[%s4808_s11 + $0x374] sm:$0xf0]  ;;  %v3197_v31 = vld [vmem:[%s4808_s11 + $0x27c] sm:$0xf] }
 0x282   :  { %v1076_v46 = vadd.f32 %v4180_v17, %v1071_v63  ;;  %v3220_v17 = vld [vmem:[%s4808_s11 + $0x330] sm:$0xf0]  ;;  %v2875_v63 = vor.u32 %v3199_v57, %v2874_v11  ;;  %v3221_v11 = vld [vmem:[%s4808_s11 + $0x338] sm:$0xf0]  ;;  %v3218_v57 = vld [vmem:[%s4808_s11 + $0x324] sm:$0xf] }
 0x283   :  { %1896 = vmatpush.bf16.msra.mxu0 %v2787_v8  ;;  %v2959_v26 = vor.u32 %v3220_v17, %v2958_v15  ;;  %1857 = vmatpush.bf16.msra.mxu1 %v2559_v18  ;;  %v2818_v8 = vld [vmem:[%s4808_s11 + $0x200] sm:$0xf]  ;;  %v2622_v15 = vld [vmem:[%s4808_s11 + $0x78] sm:$0xf]  ;;  %v3136_v17 = vld [vmem:[%s4808_s11 + $0x90] sm:$0xf0]  ;;  %v2967_v3 = vor.u32 %v3221_v11, %v2966_v56  ;;  %v2971_v4 = vor.u32 %v3218_v57, %v2968_v58 }
 0x284   :  { %v1077_v13 = vpack.c.bf16 %v1076_v46, %v1076_v46  ;;  %v2651_v46 = vor.u32 %v3143_v5, %v2650_v55  ;;  %v2623_v18 = vor.u32 %v3136_v17, %v2622_v15  ;;  %v3211_v5 = vld [vmem:[%s4808_s11 + $0x2ec] sm:$0xf]  ;;  %v2910_v15 = vld [vmem:[%s4808_s11 + $0x2b0] sm:$0xf]  ;;  %v2884_v32 = vld [vmem:[%s4808_s11 + $0x294] sm:$0xf0] }
 0x285   :  { %1931 = vmatpush.bf16.msrb.mxu3 %v2683_v62  ;;  %v3207_v17 = vld [vmem:[%s4808_s11 + $0x2c8] sm:$0xf0]  ;;  %v2826_v11 = vld [vmem:[%s4808_s11 + $0x208] sm:$0xf]  ;;  %v3186_v57 = vld [vmem:[%s4808_s11 + $0x220] sm:$0xf0] }
 0x286   :  { %2554 = vmatmul.msk.bf16.vlgmr.msra.gmra.mxu2 %vm1025_vm2, %v1077_v13  ;;  %2555 = vmatmul.msk.bf16.vlgmr.msrb.gmra.mxu0 %vm1025_vm2, %v1077_v13  ;;  %v2820_v13 = vld [vmem:[%s4808_s11 + $0x21c] sm:$0xf0]  ;;  %v3183_v58 = vld [vmem:[%s4808_s11 + $0x20c] sm:$0xf] }
 0x287   :  { %1915 = vmatpush.bf16.msra.mxu2 %v2987_v60  ;;  %1941 = vmatpush.bf16.msrb.mxu0 %v2991_v14  ;;  %v3185_v60 = vld [vmem:[%s4808_s11 + $0x218] sm:$0xf0]  ;;  %v2823_v14 = vor.u32 %v3182_v12, %v2820_v13  ;;  %v2744_v12 = vld [vmem:[%s4808_s11 + $0x17c] sm:$0xf0] }
 0x288   :  { %1902 = vmatpush.bf16.msrb.mxu1 %v2763_v22  ;;  %v2819_v10 = vor.u32 %v3185_v60, %v2818_v8  ;;  %v2790_v22 = vld [vmem:[%s4808_s11 + $0x1c8] sm:$0xf]  ;;  %v3165_v60 = vld [vmem:[%s4808_s11 + $0x178] sm:$0xf0] }
 0x289   :  { %1932 = vmatpush.bf16.msrb.mxu3 %v2655_v7  ;;  %v2791_v24 = vor.u32 %v3178_v23, %v2790_v22  ;;  %v2742_v7 = vld [vmem:[%s4808_s11 + $0x160] sm:$0xf]  ;;  %v2714_v23 = vld [vmem:[%s4808_s11 + $0x128] sm:$0xf] }
 0x28b   :  { %1916 = vmatpush.bf16.msra.mxu2 %v2959_v26  ;;  %1942 = vmatpush.bf16.msrb.mxu0 %v2963_v29  ;;  %v2792_v26 = vld [vmem:[%s4808_s11 + $0x1e4] sm:$0xf0]  ;;  %v3129_v29 = vld [vmem:[%s4808_s11 + $0x58] sm:$0xf0] }
 0x28c   :  { %1903 = vmatpush.bf16.msrb.mxu1 %v2735_v35  ;;  %v2795_v27 = vor.u32 %v3175_v25, %v2792_v26  ;;  %v2595_v30 = vor.u32 %v3129_v29, %v2594_v28  ;;  %v2566_v35 = vld [vmem:[%s4808_s11 + $0x8] sm:$0xf]  ;;  %v3155_v25 = vld [vmem:[%s4808_s11 + $0x12c] sm:$0xf]  ;;  %v2882_v29 = vld [vmem:[%s4808_s11 + $0x278] sm:$0xf] }
 0x28d   :  { %1933 = vmatpush.bf16.msrb.mxu3 %v2627_v21  ;;  %v2567_v37 = vor.u32 %v3122_v36, %v2566_v35  ;;  %v2743_v21 = vor.u32 %v3165_v60, %v2742_v7  ;;  %v2716_v26 = vld [vmem:[%s4808_s11 + $0x144] sm:$0xf0]  ;;  %v2686_v36 = vld [vmem:[%s4808_s11 + $0xf0] sm:$0xf]  ;;  %v3229_v7 = vld [vmem:[%s4808_s11 + $0x378] sm:$0xf0] }
 0x28e   :  { %v2719_v35 = vor.u32 %v3155_v25, %v2716_v26  ;;  %v2602_v60 = vld [vmem:[%s4808_s11 + $0x48] sm:$0xf]  ;;  %v2576_v25 = vld [vmem:[%s4808_s11 + $0x2c] sm:$0xf0]  ;;  %v2778_v26 = vld [vmem:[%s4808_s11 + $0x1a0] sm:$0xf] }
 0x28f   :  { %1917 = vmatpush.bf16.msra.mxu2 %v2931_v39  ;;  %1943 = vmatpush.bf16.msrb.mxu0 %v2935_v43  ;;  %v2568_v39 = vld [vmem:[%s4808_s11 + $0x24] sm:$0xf0]  ;;  %v1082_v43 = vperm.slane %v1079_v42, 1  ;;  %v2887_v42 = vor.u32 %v3197_v31, %v2884_v32  ;;  %v2946_v31 = vld [vmem:[%s4808_s11 + $0x2f0] sm:$0xf] }
 0x290   :  { %1904 = vmatpush.bf16.msrb.mxu1 %v2707_v49  ;;  %v2571_v40 = vor.u32 %v3119_v38, %v2568_v39  ;;  %v3225_v49 = vld [vmem:[%s4808_s11 + $0x35c] sm:$0xf]  ;;  %v3148_v38 = vld [vmem:[%s4808_s11 + $0xf4] sm:$0xf]  ;;  %v2688_v39 = vld [vmem:[%s4808_s11 + $0x10c] sm:$0xf0] }
 0x291   :  { %1934 = vmatpush.bf16.msrb.mxu3 %v2599_v33  ;;  %v2999_v54 = vor.u32 %v3225_v49, %v2996_v50  ;;  %v2691_v49 = vor.u32 %v3148_v38, %v2688_v39  ;;  %v2658_v50 = vld [vmem:[%s4808_s11 + $0xb8] sm:$0xf]  ;;  %v3215_v32 = vld [vmem:[%s4808_s11 + $0x308] sm:$0xf0]  ;;  %v3208_v39 = vld [vmem:[%s4808_s11 + $0x2d0] sm:$0xf0] }
 0x292   :  { %v2918_v38 = vld [vmem:[%s4808_s11 + $0x2b8] sm:$0xf] }
 0x293   :  { %1918 = vmatpush.bf16.msra.mxu2 %v2903_v53  ;;  %1944 = vmatpush.bf16.msrb.mxu0 %v2907_v9  ;;  %v2995_v53 = vor.u32 %v3228_v48, %v2994_v45  ;;  %v3190_v45 = vld [vmem:[%s4808_s11 + $0x244] sm:$0xf] }
 0x294   :  { %1905 = vmatpush.bf16.msrb.mxu1 %v2679_v61  ;;  %v2770_v61 = vld [vmem:[%s4808_s11 + $0x198] sm:$0xf] }
 0x295   :  { %1935 = vmatpush.bf16.msrb.mxu3 %v2571_v40 }
 0x297   :  { %1919 = vmatpush.bf16.msra.mxu2 %v2875_v63  ;;  %1945 = vmatpush.bf16.msrb.mxu0 %v2879_v0  ;;  %v3172_v63 = vld [vmem:[%s4808_s11 + $0x1b0] sm:$0xf0]  ;;  %v3169_v0 = vld [vmem:[%s4808_s11 + $0x19c] sm:$0xf] }
 0x298   :  { %1906 = vmatpush.bf16.msrb.mxu1 %v2651_v46  ;;  %v2940_v46 = vld [vmem:[%s4808_s11 + $0x304] sm:$0xf0]  ;;  %v2771_v34 = vor.u32 %v3172_v63, %v2770_v61  ;;  %v2775_v41 = vor.u32 %v3169_v0, %v2772_v1  ;;  %v2630_v63 = vld [vmem:[%s4808_s11 + $0x80] sm:$0xf]  ;;  %v3137_v0 = vld [vmem:[%s4808_s11 + $0x98] sm:$0xf0] }
 0x299   :  { %v3134_v1 = vld [vmem:[%s4808_s11 + $0x84] sm:$0xf] }
 0x29b   :  { %1920 = vmatpush.bf16.msra.mxu2 %v2847_v6  ;;  %1946 = vmatpush.bf16.msrb.mxu0 %v2851_v16  ;;  %v2938_v6 = vld [vmem:[%s4808_s11 + $0x2e8] sm:$0xf]  ;;  %v3214_v16 = vld [vmem:[%s4808_s11 + $0x300] sm:$0xf0] }
 0x29c   :  { %1907 = vmatpush.bf16.msrb.mxu1 %v2623_v18  ;;  %v2939_v13 = vor.u32 %v3214_v16, %v2938_v6  ;;  %v3204_v18 = vld [vmem:[%s4808_s11 + $0x2b4] sm:$0xf]  ;;  %v2798_v6 = vld [vmem:[%s4808_s11 + $0x1d0] sm:$0xf]  ;;  %v3179_v16 = vld [vmem:[%s4808_s11 + $0x1e8] sm:$0xf0] }
 0x29d   :  { %v2915_v28 = vor.u32 %v3204_v18, %v2912_v19 }
 0x29f   :  { %1921 = vmatpush.bf16.msra.mxu2 %v2819_v10  ;;  %1947 = vmatpush.bf16.msrb.mxu0 %v2823_v14  ;;  %v3162_v10 = vld [vmem:[%s4808_s11 + $0x164] sm:$0xf]  ;;  %v2943_v14 = vor.u32 %v3211_v5, %v2940_v46  ;;  %v2800_v5 = vld [vmem:[%s4808_s11 + $0x1ec] sm:$0xf0]  ;;  %v2631_v46 = vor.u32 %v3137_v0, %v2630_v63 }
 0x2a0   :  { %1908 = vmatpush.bf16.msrb.mxu1 %v2595_v30  ;;  %v2747_v22 = vor.u32 %v3162_v10, %v2744_v12  ;;  %v3200_v30 = vld [vmem:[%s4808_s11 + $0x290] sm:$0xf0]  ;;  %v3130_v10 = vld [vmem:[%s4808_s11 + $0x60] sm:$0xf0]  ;;  %v3127_v12 = vld [vmem:[%s4808_s11 + $0x4c] sm:$0xf] }
 0x2a1   :  { %v2883_v40 = vor.u32 %v3200_v30, %v2882_v29  ;;  %v2603_v18 = vor.u32 %v3130_v10, %v2602_v60  ;;  %v3138_v63 = vld [vmem:[%s4808_s11 + $0xa0] sm:$0xf0] }
 0x2a3   :  { %1922 = vmatpush.bf16.msra.mxu2 %v2791_v24  ;;  %1948 = vmatpush.bf16.msrb.mxu0 %v2795_v27  ;;  %v3158_v24 = vld [vmem:[%s4808_s11 + $0x140] sm:$0xf0]  ;;  %v2911_v27 = vor.u32 %v3207_v17, %v2910_v15 }
 0x2a4   :  { %1909 = vmatpush.bf16.msrb.mxu1 %v2567_v37  ;;  %v2715_v33 = vor.u32 %v3158_v24, %v2714_v23  ;;  %v3151_v37 = vld [vmem:[%s4808_s11 + $0x108] sm:$0xf0]  ;;  %v3120_v24 = vld [vmem:[%s4808_s11 + $0x14] sm:$0xf] }
 0x2a5   :  { %v2687_v48 = vor.u32 %v3151_v37, %v2686_v36  ;;  %v3123_v23 = vld [vmem:[%s4808_s11 + $0x28] sm:$0xf0]  ;;  %v2579_v30 = vor.u32 %v3120_v24, %v2576_v25  ;;  %v3166_v36 = vld [vmem:[%s4808_s11 + $0x180] sm:$0xf0]  ;;  %v2947_v37 = vor.u32 %v3215_v32, %v2946_v31 }
 0x303   :  { %v1122_v44 = vpop.f32.mrf.mxu0 }
 0x304   :  { %v1123_v47 = vadd.f32 %v1122_v44, %v1082_v43  ;;  %v2854_v43 = vld [vmem:[%s4808_s11 + $0x240] sm:$0xf]  ;;  %v3193_v44 = vld [vmem:[%s4808_s11 + $0x258] sm:$0xf0] }
 0x306   :  { %v1127_v51 = vmax.f32 %v1123_v47, 0.0  ;;  %v2856_v47 = vld [vmem:[%s4808_s11 + $0x25c] sm:$0xf0] }
 0x307   :  { %v2859_v56 = vor.u32 %v3190_v45, %v2856_v47  ;;  %v2890_v45 = vld [vmem:[%s4808_s11 + $0x280] sm:$0xf]  ;;  %v3201_v47 = vld [vmem:[%s4808_s11 + $0x298] sm:$0xf0] }
 0x308   :  { %v4490_v9 = vpack.c.bf16 %v1127_v51, %v1127_v51  ;;  %v3144_v51 = vld [vmem:[%s4808_s11 + $0xd0] sm:$0xf0] }
 0x309   :  { %v1109_v59 = vpop.f32.mrf.mxu2  ;;  %v2659_v61 = vor.u32 %v3144_v51, %v2658_v50  ;;  %v3152_v50 = vld [vmem:[%s4808_s11 + $0x110] sm:$0xf0]  ;;  %v2891_v51 = vor.u32 %v3201_v47, %v2890_v45 }
 0x30a   :  { %v1110_v62 = vadd.f32 %v1109_v59, %v1081_v52  ;;  %1871 = vmatmul.bf16.vlgmr.msrb.gmra.mxu2 %v4490_v9  ;;  %1897 = vmatmul.bf16.vlgmr.msra.gmra.mxu0 %v4490_v9  ;;  %v3141_v52 = vld [vmem:[%s4808_s11 + $0xbc] sm:$0xf]  ;;  %v2828_v59 = vld [vmem:[%s4808_s11 + $0x224] sm:$0xf0] }
 0x30b   :  { %1967 = vmatpush.bf16.msrb.mxu2 %v2995_v53  ;;  %v1124_v2 = vpop.f32.mrf.mxu0  ;;  %1993 = vmatpush.bf16.msra.mxu0 %v2999_v54  ;;  %v2660_v53 = vld [vmem:[%s4808_s11 + $0xd4] sm:$0xf0]  ;;  %v2855_v54 = vor.u32 %v3193_v44, %v2854_v43  ;;  %v3159_v43 = vld [vmem:[%s4808_s11 + $0x148] sm:$0xf0]  ;;  %v2919_v44 = vor.u32 %v3208_v39, %v2918_v38 }
 0x30c   :  { %v1126_v55 = vmax.f32 %v1110_v62, 0.0  ;;  %v2663_v62 = vor.u32 %v3141_v52, %v2660_v53  ;;  %v2632_v2 = vld [vmem:[%s4808_s11 + $0x9c] sm:$0xf0]  ;;  %v2862_v52 = vld [vmem:[%s4808_s11 + $0x248] sm:$0xf] }
 0x30d   :  { %v3194_v53 = vld [vmem:[%s4808_s11 + $0x260] sm:$0xf0] }
 0x30e   :  { %v4530_v8 = vpack.c.bf16 %v1126_v55, %v1126_v55  ;;  %v3176_v55 = vld [vmem:[%s4808_s11 + $0x1d4] sm:$0xf] }
 0x30f   :  { %1968 = vmatpush.bf16.msrb.mxu2 %v2967_v3  ;;  %1994 = vmatpush.bf16.msra.mxu0 %v2971_v4  ;;  %v2827_v3 = vor.u32 %v3186_v57, %v2826_v11  ;;  %v2831_v4 = vor.u32 %v3183_v58, %v2828_v59  ;;  %v2803_v15 = vor.u32 %v3176_v55, %v2800_v5  ;;  %v3145_v11 = vld [vmem:[%s4808_s11 + $0xd8] sm:$0xf0]  ;;  %v2834_v58 = vld [vmem:[%s4808_s11 + $0x210] sm:$0xf]  ;;  %v3187_v59 = vld [vmem:[%s4808_s11 + $0x228] sm:$0xf0] }
 0x310   :  { %1858 = vmatmul.bf16.vlgmr.msra.gmra.mxu1 %v4530_v8  ;;  %1884 = vmatmul.bf16.vlgmr.msra.gmra.mxu3 %v4530_v8  ;;  %v2863_v57 = vor.u32 %v3194_v53, %v2862_v52  ;;  %v2835_v0 = vor.u32 %v3187_v59, %v2834_v58  ;;  %v2582_v5 = vld [vmem:[%s4808_s11 + $0x18] sm:$0xf] }
 0x311   :  { %1954 = vmatpush.bf16.msra.mxu1 %v2771_v34  ;;  %v1111_v20 = vpop.f32.mrf.mxu2  ;;  %1980 = vmatpush.bf16.msra.mxu3 %v2775_v41  ;;  %v2635_v34 = vor.u32 %v3134_v1, %v2632_v2  ;;  %v3002_v41 = vld [vmem:[%s4808_s11 + $0x360] sm:$0xf]  ;;  %v2806_v1 = vld [vmem:[%s4808_s11 + $0x1d8] sm:$0xf]  ;;  %v3180_v2 = vld [vmem:[%s4808_s11 + $0x1f0] sm:$0xf0] }
 0x312   :  { %v3003_v17 = vor.u32 %v3229_v7, %v3002_v41  ;;  %v2974_v20 = vld [vmem:[%s4808_s11 + $0x328] sm:$0xf]  ;;  %v4784_v7 = vld [vmem:[%s4809_s12] sm:$0x7f] }
 0x313   :  { %1969 = vmatpush.bf16.msrb.mxu2 %v2939_v13  ;;  %1995 = vmatpush.bf16.msra.mxu0 %v2943_v14  ;;  %v2604_v13 = vld [vmem:[%s4808_s11 + $0x64] sm:$0xf0]  ;;  %v2799_v14 = vor.u32 %v3179_v16, %v2798_v6  ;;  %v3131_v6 = vld [vmem:[%s4808_s11 + $0x68] sm:$0xf0]  ;;  %v2807_v16 = vor.u32 %v3180_v2, %v2806_v1  ;;  %v1260_v60 = vperm.slane %v4784_v7, 0  ;;  %v1262_v25 = vperm.slane %v4784_v7, 2 }
 0x314   :  { %v2607_v19 = vor.u32 %v3127_v12, %v2604_v13 }
 0x315   :  { %1955 = vmatpush.bf16.msra.mxu1 %v2743_v21  ;;  %1981 = vmatpush.bf16.msra.mxu3 %v2747_v22  ;;  %v3222_v21 = vld [vmem:[%s4808_s11 + $0x340] sm:$0xf0]  ;;  %v2574_v22 = vld [vmem:[%s4808_s11 + $0x10] sm:$0xf] }
 0x316   :  { %v2575_v29 = vor.u32 %v3123_v23, %v2574_v22 }
 0x317   :  { %1970 = vmatpush.bf16.msrb.mxu2 %v2911_v27  ;;  %1996 = vmatpush.bf16.msra.mxu0 %v2915_v28  ;;  %v3173_v27 = vld [vmem:[%s4808_s11 + $0x1b8] sm:$0xf0]  ;;  %v2975_v28 = vor.u32 %v3222_v21, %v2974_v20 }
 0x319   :  { %1956 = vmatpush.bf16.msra.mxu1 %v2715_v33  ;;  %1982 = vmatpush.bf16.msra.mxu3 %v2719_v35  ;;  %v2779_v33 = vor.u32 %v3173_v27, %v2778_v26  ;;  %v2750_v35 = vld [vmem:[%s4808_s11 + $0x168] sm:$0xf] }
 0x31a   :  { %1923 = vmatmul.bf16.vlgmr.msra.gmra.mxu2 %v4490_v9  ;;  %1949 = vmatmul.bf16.vlgmr.msrb.gmra.mxu0 %v4490_v9 }
 0x31b   :  { %1971 = vmatpush.bf16.msrb.mxu2 %v2883_v40  ;;  %1997 = vmatpush.bf16.msra.mxu0 %v2887_v42  ;;  %v2751_v40 = vor.u32 %v3166_v36, %v2750_v35  ;;  %v2722_v42 = vld [vmem:[%s4808_s11 + $0x130] sm:$0xf]  ;;  %v1263_v36 = vperm.slane %v4784_v7, 3 }
 0x31d   :  { %1957 = vmatpush.bf16.msra.mxu1 %v2687_v48  ;;  %1983 = vmatpush.bf16.msra.mxu3 %v2691_v49  ;;  %v2723_v48 = vor.u32 %v3159_v43, %v2722_v42  ;;  %v2694_v49 = vld [vmem:[%s4808_s11 + $0xf8] sm:$0xf] }
 0x31f   :  { %1972 = vmatpush.bf16.msrb.mxu2 %v2855_v54  ;;  %1998 = vmatpush.bf16.msra.mxu0 %v2859_v56  ;;  %v2695_v54 = vor.u32 %v3152_v50, %v2694_v49  ;;  %v2666_v56 = vld [vmem:[%s4808_s11 + $0xc0] sm:$0xf]  ;;  %v1264_v50 = vperm.slane %v4784_v7, 4 }
 0x320   :  { %1910 = vmatmul.bf16.vlgmr.msrb.gmra.mxu1 %v4530_v8  ;;  %1936 = vmatmul.bf16.vlgmr.msrb.gmra.mxu3 %v4530_v8 }
 0x321   :  { %1958 = vmatpush.bf16.msra.mxu1 %v2659_v61  ;;  %1984 = vmatpush.bf16.msra.mxu3 %v2663_v62  ;;  %v2667_v61 = vor.u32 %v3145_v11, %v2666_v56  ;;  %v2638_v62 = vld [vmem:[%s4808_s11 + $0x88] sm:$0xf] }
 0x323   :  { %1973 = vmatpush.bf16.msrb.mxu2 %v2827_v3  ;;  %1999 = vmatpush.bf16.msra.mxu0 %v2831_v4  ;;  %v2639_v3 = vor.u32 %v3138_v63, %v2638_v62  ;;  %v2610_v4 = vld [vmem:[%s4808_s11 + $0x50] sm:$0xf]  ;;  %v1265_v62 = vperm.slane %v4784_v7, 5 }
 0x324   :  { %v2611_v55 = vor.u32 %v3131_v6, %v2610_v4 }
 0x325   :  { %1959 = vmatpush.bf16.msra.mxu1 %v2631_v46  ;;  %1985 = vmatpush.bf16.msra.mxu3 %v2635_v34  ;;  %v3124_v46 = vld [vmem:[%s4808_s11 + $0x30] sm:$0xf0]  ;;  %s3281_s11 = smov [#allocation2]  }
 0x326   :  { %v2583_v34 = vor.u32 %v3124_v46, %v2582_v5  ;;  %s2081_s12 = sshll.u32 %s3281_s11, 4  ;;  %s2082_s12 = int_to_ptr.vmem [resolvable:$true] %s2081_s12 }
 0x327   :  { %1974 = vmatpush.bf16.msrb.mxu2 %v2799_v14  ;;  %2000 = vmatpush.bf16.msra.mxu0 %v2803_v15 }
 0x329   :  { %1960 = vmatpush.bf16.msra.mxu1 %v2603_v18  ;;  %1986 = vmatpush.bf16.msra.mxu3 %v2607_v19 }
 0x32a   :  { %1975 = vmatmul.bf16.vlgmr.msrb.gmra.mxu2 %v4490_v9  ;;  %2001 = vmatmul.bf16.vlgmr.msra.gmra.mxu0 %v4490_v9 }
 0x32b   :  { %2019 = vmatpush.bf16.msra.mxu2 %v3003_v17  ;;  %v1261_v17 = vperm.slane %v4784_v7, 1 }
 0x32d   :  { %1961 = vmatpush.bf16.msra.mxu1 %v2575_v29  ;;  %1987 = vmatpush.bf16.msra.mxu3 %v2579_v30 }
 0x32f   :  { %2020 = vmatpush.bf16.msra.mxu2 %v2975_v28 }
 0x330   :  { %1962 = vmatmul.bf16.vlgmr.msra.gmra.mxu1 %v4530_v8  ;;  %1988 = vmatmul.bf16.vlgmr.msra.gmra.mxu3 %v4530_v8 }
 0x331   :  { %2006 = vmatpush.bf16.msrb.mxu1 %v2779_v33 }
 0x333   :  { %2021 = vmatpush.bf16.msra.mxu2 %v2947_v37 }
 0x335   :  { %2007 = vmatpush.bf16.msrb.mxu1 %v2751_v40 }
 0x337   :  { %2022 = vmatpush.bf16.msra.mxu2 %v2919_v44 }
 0x339   :  { %2008 = vmatpush.bf16.msrb.mxu1 %v2723_v48 }
 0x33b   :  { %2023 = vmatpush.bf16.msra.mxu2 %v2891_v51 }
 0x33d   :  { %2009 = vmatpush.bf16.msrb.mxu1 %v2695_v54 }
 0x33f   :  { %2024 = vmatpush.bf16.msra.mxu2 %v2863_v57 }
 0x341   :  { %2010 = vmatpush.bf16.msrb.mxu1 %v2667_v61 }
 0x343   :  { %2025 = vmatpush.bf16.msra.mxu2 %v2835_v0 }
 0x345   :  { %2011 = vmatpush.bf16.msrb.mxu1 %v2639_v3 }
 0x347   :  { %2026 = vmatpush.bf16.msra.mxu2 %v2807_v16 }
 0x349   :  { %2012 = vmatpush.bf16.msrb.mxu1 %v2611_v55 }
 0x34a   :  { %2027 = vmatmul.bf16.vlgmr.msra.gmra.mxu2 %v4490_v9 }
 0x34d   :  { %2013 = vmatpush.bf16.msrb.mxu1 %v2583_v34 }
 0x350   :  { %2014 = vmatmul.bf16.vlgmr.msrb.gmra.mxu1 %v4530_v8 }
 0x387   :  { %v1898_v41 = vpop.f32.mrf.mxu0 }
 0x38d   :  { %v1859_v10 = vpop.f32.mrf.mxu1  ;;  %v1872_v12 = vpop.f32.mrf.mxu2 }
 0x38e   :  { %v1860_v13 = vadd.f32 %v1859_v10, %v1260_v60 }
 0x38f   :  { %v1900_v14 = vpop.f32.mrf.mxu0 }
 0x390   :  { %v1873_v15 = vadd.f32 %v1872_v12, %v1860_v13  ;;  %v1266_v12 = vperm.slane %v4784_v7, 6 }
 0x392   :  { %v2032_v18 = vmul.f32 0.5, %v1873_v15 }
 0x393   :  { %v1885_v9 = vpop.f32.mrf.mxu3 }
 0x394   :  { %3238 = vtanh.f32 %v2032_v18  ;;  %v1886_v19 = vadd.f32 %v1885_v9, %v1261_v17 }
 0x395   :  { %v1861_v8 = vpop.f32.mrf.mxu1  ;;  %v1874_v20 = vpop.f32.mrf.mxu2 }
 0x396   :  { %v1899_v21 = vadd.f32 %v1898_v41, %v1886_v19 }
 0x397   :  { %v1950_v22 = vpop.f32.mrf.mxu0 }
 0x398   :  { %v2033_v23 = vmul.f32 0.5, %v1899_v21 }
 0x39a   :  { %v3239_v24 = vpop.eup %3238  ;;  %3240 = vtanh.f32 %v2033_v23 }
 0x39b   :  { %v2046_v26 = vadd.f32 1.0, %v3239_v24  ;;  %v1887_v27 = vpop.f32.mrf.mxu3 }
 0x39d   :  { %v2053_v28 = vmul.f32 0.5, %v2046_v26  ;;  %v1911_v29 = vpop.f32.mrf.mxu1  ;;  %v1924_v30 = vpop.f32.mrf.mxu2 }
 0x39e   :  { %v1912_v31 = vadd.f32 %v1911_v29, %v1262_v25 }
 0x39f   :  { %2060 = vst [vmem:[#allocation2] sm:$0xff] %v2053_v28  ;;  %v1952_v32 = vpop.f32.mrf.mxu0 }
 0x3a0   :  { %v3241_v33 = vpop.eup %3240  ;;  %v1925_v35 = vadd.f32 %v1924_v30, %v1912_v31 }
 0x3a1   :  { %v2047_v37 = vadd.f32 1.0, %v3241_v33 }
 0x3a2   :  { %v2034_v38 = vmul.f32 0.5, %v1925_v35 }
 0x3a3   :  { %v2054_v39 = vmul.f32 0.5, %v2047_v37  ;;  %v1937_v40 = vpop.f32.mrf.mxu3 }
 0x3a4   :  { %3242 = vtanh.f32 %v2034_v38  ;;  %v1938_v42 = vadd.f32 %v1937_v40, %v1263_v36 }
 0x3a5   :  { %2061 = vst [vmem:[#allocation2 + $0x8] sm:$0xff] %v2054_v39  ;;  %v1913_v43 = vpop.f32.mrf.mxu1  ;;  %v1926_v44 = vpop.f32.mrf.mxu2 }
 0x3a6   :  { %v1951_v45 = vadd.f32 %v1950_v22, %v1938_v42 }
 0x3a7   :  { %v2002_v47 = vpop.f32.mrf.mxu0 }
 0x3a8   :  { %v2035_v48 = vmul.f32 0.5, %v1951_v45 }
 0x3aa   :  { %v3243_v49 = vpop.eup %3242  ;;  %3244 = vtanh.f32 %v2035_v48 }
 0x3ab   :  { %v2048_v51 = vadd.f32 1.0, %v3243_v49  ;;  %v1939_v52 = vpop.f32.mrf.mxu3 }
 0x3ad   :  { %v2055_v53 = vmul.f32 0.5, %v2048_v51  ;;  %v1963_v54 = vpop.f32.mrf.mxu1  ;;  %v1976_v56 = vpop.f32.mrf.mxu2 }
 0x3ae   :  { %v1964_v11 = vadd.f32 %v1963_v54, %v1264_v50 }
 0x3af   :  { %2062 = vst [vmem:[#allocation2 + $0x10] sm:$0xff] %v2055_v53  ;;  %v2004_v57 = vpop.f32.mrf.mxu0 }
 0x3b0   :  { %v3245_v58 = vpop.eup %3244  ;;  %v1977_v59 = vadd.f32 %v1976_v56, %v1964_v11 }
 0x3b1   :  { %v2049_v61 = vadd.f32 1.0, %v3245_v58 }
 0x3b2   :  { %v2036_v63 = vmul.f32 0.5, %v1977_v59 }
 0x3b3   :  { %v2056_v0 = vmul.f32 0.5, %v2049_v61  ;;  %v1989_v1 = vpop.f32.mrf.mxu3 }
 0x3b4   :  { %3246 = vtanh.f32 %v2036_v63  ;;  %v1990_v2 = vadd.f32 %v1989_v1, %v1265_v62 }
 0x3b5   :  { %2063 = vst [vmem:[#allocation2 + $0x18] sm:$0xff] %v2056_v0  ;;  %v1965_v3 = vpop.f32.mrf.mxu1  ;;  %v1978_v4 = vpop.f32.mrf.mxu2 }
 0x3b6   :  { %v2003_v6 = vadd.f32 %v2002_v47, %v1990_v2 }
 0x3b8   :  { %v2037_v16 = vmul.f32 0.5, %v2003_v6 }
 0x3ba   :  { %v3247_v55 = vpop.eup %3246  ;;  %3248 = vtanh.f32 %v2037_v16 }
 0x3bb   :  { %v2050_v5 = vadd.f32 1.0, %v3247_v55  ;;  %v1991_v46 = vpop.f32.mrf.mxu3 }
 0x3bd   :  { %v2057_v34 = vmul.f32 0.5, %v2050_v5 }
 0x3bf   :  { %2064 = vst [vmem:[#allocation2 + $0x20] sm:$0xff] %v2057_v34 }
 0x3c0   :  { %v3249_v41 = vpop.eup %3248 }
 0x3c1   :  { %v2051_v60 = vadd.f32 1.0, %v3249_v41 }
 0x3c3   :  { %v2058_v10 = vmul.f32 0.5, %v2051_v60 }
 0x3c5   :  { %2065 = vst [vmem:[#allocation2 + $0x28] sm:$0xff] %v2058_v10 }
 0x3cd   :  { %v2015_v13 = vpop.f32.mrf.mxu1  ;;  %v2028_v14 = vpop.f32.mrf.mxu2 }
 0x3ce   :  { %v2016_v15 = vadd.f32 %v2015_v13, %v1266_v12 }
 0x3d0   :  { %v2029_v17 = vadd.f32 %v2028_v14, %v2016_v15 }
 0x3d2   :  { %v2038_v18 = vmul.f32 0.5, %v2029_v17 }
 0x3d4   :  { %3250 = vtanh.f32 %v2038_v18 }
 0x3d5   :  { %v2017_v9 = vpop.f32.mrf.mxu1  ;;  %v2030_v19 = vpop.f32.mrf.mxu2 }
 0x3da   :  { %v3251_v8 = vpop.eup %3250 }
 0x3db   :  { %v2052_v20 = vadd.f32 1.0, %v3251_v8 }
 0x3dd   :  { %v2059_v21 = vmul.f32 0.5, %v2052_v20 }
 0x3df   :  { %2066 = vst.msk [vmem:[#allocation2 + $0x30] sm:$0xff] %vm672_vm0, %v2059_v21 }
 0x3e0   :  { %2086 = dma.vmem_to_hbm [thread:$0]  %s2082_s12, 896, %s2084_s8, [#allocation3]  }
 0x3e1   :  { %3276 = dma.done.wait [#allocation3], 896  }
 0x3e2   :  { %3277 = vsyncadd [#allocation3], 4294966400 }
 0x3e3   :  { %2093 = vsyncpa [#allocation3], 1 }

</bundles_post_ra>
